<compile_context>
chip_gen: v5e
topology: v5e:2x2
jax: 0.10.0
libtpu: 0.0.40
codegen_flags: <defaults>
</compile_context>

<pallas_src>
import functools

import jax
import jax.numpy as jnp
from jax.experimental import pallas as pl
from jax.experimental.pallas import tpu as pltpu

S = 32          # final_corr_size (hard-coded in CATs.__init__)
NHEAD = 4
BETA = 0.02
T_H = 16        # tile over the target-H dimension (8 MB all-heads block, 2x buffered)


# --------------------------------------------------------------------------------------
# Kernel 1: affinity_proj = Conv2d(k=3, s=2, p=1) + ReLU, as an im2col matmul on the MXU.
# Output ref is the K-resident accumulator (no scratch); bias+ReLU applied on last k.
# --------------------------------------------------------------------------------------
def conv_mm_kernel(a_ref, w_ref, b_ref, o_ref):
    kk = pl.program_id(0)

    @pl.when(kk == 0)
    def _():
        o_ref[...] = jnp.zeros_like(o_ref)

    # bf16 x bf16 -> f32 single MXU pass.
    o_ref[...] += jnp.dot(a_ref[...], w_ref[...], preferred_element_type=jnp.float32)

    @pl.when(kk == pl.num_programs(0) - 1)
    def _():
        o_ref[...] = jnp.maximum(o_ref[...] + b_ref[...], 0.0)


def _im2col(x_nchw, k, stride, pad, OH, OW):
    B, C, _, _ = x_nchw.shape
    xp = jnp.pad(x_nchw, ((0, 0), (0, 0), (pad, pad), (pad, pad)))
    cols = []
    for kh in range(k):
        for kw in range(k):
            cols.append(xp[:, :, kh:kh + stride * OH:stride, kw:kw + stride * OW:stride])
    col = jnp.stack(cols, axis=2)                                   # (B, C, 9, OH, OW)
    return col.transpose(0, 3, 4, 1, 2).reshape(B * OH * OW, C * k * k)  # K order (c,kh,kw)


def affinity_proj_fused(x_list, weight, bias, *, tk=2304):
    """Conv2d(Cin, 128, 3, stride=2, pad=1) + ReLU applied to several NCHW inputs that
    share the same weights (target + source of one level fused -> weight streamed once).
    Dropout2d is identity in eval."""
    B, C, H, W = x_list[0].shape
    k, stride, pad = 3, 2, 1
    OH = (H + 2 * pad - k) // stride + 1
    OW = (W + 2 * pad - k) // stride + 1

    cols = [_im2col(x, k, stride, pad, OH, OW) for x in x_list]
    a = jnp.concatenate(cols, axis=0).astype(jnp.bfloat16)          # (n*B*OH*OW, K)
    w2d = weight.reshape(weight.shape[0], C * k * k).T.astype(jnp.bfloat16)  # (K, 128)

    M, K = a.shape
    N = weight.shape[0]
    tk = min(tk, K)
    assert K % tk == 0 and M % 16 == 0 and N % 128 == 0

    out = pl.pallas_call(
        conv_mm_kernel,
        out_shape=jax.ShapeDtypeStruct((M, N), jnp.float32),
        grid_spec=pltpu.PrefetchScalarGridSpec(
            num_scalar_prefetch=0,
            grid=(K // tk,),
            in_specs=[
                pl.BlockSpec((M, tk), lambda kk: (0, kk)),
                pl.BlockSpec((tk, N), lambda kk: (kk, 0)),
                pl.BlockSpec((1, N), lambda kk: (0, 0)),
            ],
            out_specs=pl.BlockSpec((M, N), lambda kk: (0, 0)),
        ),
        compiler_params=pltpu.CompilerParams(dimension_semantics=("arbitrary",)),
    )(a, w2d, bias.reshape(1, N).astype(jnp.float32))

    outs = out.reshape(len(x_list), B, OH, OW, N).transpose(0, 1, 4, 2, 3)  # (n,B,128,OH,OW)
    return [outs[i] for i in range(len(x_list))]


# --------------------------------------------------------------------------------------
# Kernel 2: corr3.mean(1) + softmax_with_temperature + soft_argmax + mapping->flow.
# All heads in one block; un-normalised softmax (row sums + reciprocal-multiply).
# --------------------------------------------------------------------------------------
def soft_argmax_flow_kernel(corr_ref, xw_ref, yw_ref, flow_ref,
                            *, nhead, beta, size, t_h):
    t = pl.program_id(1)            # tile over H_t

    # mean over heads: (t_h, W_t, Hs*Ws); sum head slices to keep temporaries small.
    c = corr_ref[0]
    for h in range(1, nhead):
        c = c + corr_ref[h]
    c = c * (1.0 / nhead)

    m = jnp.max(c, axis=-1, keepdims=True)
    e = jnp.exp((c - m) * (1.0 / beta))              # softmax_with_temperature numerator

    se = jnp.sum(e, axis=-1)                         # (t_h, W_t)
    sx = jnp.sum(e * xw_ref[...], axis=-1)           # (t_h, W_t)
    sy = jnp.sum(e * yw_ref[...], axis=-1)           # (t_h, W_t)

    inv = pl.reciprocal(se)                          # tiny (t_h*W_t elems), EUP; exact
    gx = sx * inv                                    # E[x_normal]
    gy = sy * inv                                    # E[y_normal]

    col = jax.lax.broadcasted_iota(jnp.int32, (t_h, size), 1).astype(jnp.float32)
    row = jax.lax.broadcasted_iota(jnp.int32, (t_h, size), 0).astype(jnp.float32)
    row = row + (t * t_h).astype(jnp.float32)

    half = (size - 1) / 2.0                          # unnormalise_and_convert_mapping_to_flow
    flow_ref[0, :, :] = (gx + 1.0) * half - col
    flow_ref[1, :, :] = (gy + 1.0) * half - row


def cats_soft_argmax_flow(corr_agg):
    """corr_agg: (B, nhead, H_t, W_t, H_s, W_s) aggregated correlation (corr3 pre-mean)."""
    B, nhead, Ht, Wt, Hs, Ws = corr_agg.shape
    assert Ht == Wt == Hs == Ws == S
    assert Ht % T_H == 0
    corr = corr_agg.reshape(B, nhead, Ht, Wt, Hs * Ws)

    x_normal = jnp.linspace(-1.0, 1.0, S, dtype=jnp.float32)
    y_normal = jnp.linspace(-1.0, 1.0, S, dtype=jnp.float32)
    # flattened source index j = hs * Ws + ws  (rearrange 'H_s W_s -> (H_s W_s)')
    xw = jnp.tile(x_normal, Hs).reshape(1, 1, Hs * Ws)       # x_normal[ws]
    yw = jnp.repeat(y_normal, Ws).reshape(1, 1, Hs * Ws)     # y_normal[hs]

    kern = functools.partial(soft_argmax_flow_kernel,
                             nhead=nhead, beta=BETA, size=S, t_h=T_H)
    flow = pl.pallas_call(
        kern,
        out_shape=jax.ShapeDtypeStruct((B, 2, S, S), jnp.float32),
        grid_spec=pltpu.PrefetchScalarGridSpec(
            num_scalar_prefetch=0,
            grid=(B, Ht // T_H),
            in_specs=[
                pl.BlockSpec((None, nhead, T_H, Wt, Hs * Ws),
                             lambda b, t: (b, 0, t, 0, 0)),
                pl.BlockSpec((1, 1, Hs * Ws), lambda b, t: (0, 0, 0)),
                pl.BlockSpec((1, 1, Hs * Ws), lambda b, t: (0, 0, 0)),
            ],
            out_specs=pl.BlockSpec((None, 2, T_H, S), lambda b, t: (b, 0, t, 0)),
        ),
        compiler_params=pltpu.CompilerParams(
            dimension_semantics=("parallel", "parallel"),
            vmem_limit_bytes=48 * 1024 * 1024,   # 2x8MB corr buffers + softmax temps
        ),
    )(corr, xw, yw)
    return flow


# --------------------------------------------------------------------------------------
# Pure-JAX references (for correctness checks only).
# --------------------------------------------------------------------------------------
def conv_reference(x, w, b):
    y = jax.lax.conv_general_dilated(
        x, w, window_strides=(2, 2), padding=((1, 1), (1, 1)),
        dimension_numbers=("NCHW", "OIHW", "NCHW"),
        precision=jax.lax.Precision.HIGHEST)
    return jnp.maximum(y + b[None, :, None, None], 0.0)


def flow_reference(corr_agg):
    B = corr_agg.shape[0]
    x_normal = jnp.linspace(-1.0, 1.0, S, dtype=jnp.float32)
    y_normal = jnp.linspace(-1.0, 1.0, S, dtype=jnp.float32)
    corr3 = corr_agg.mean(axis=1)                                   # (B, Ht, Wt, Hs, Ws)
    corr = jnp.transpose(corr3, (0, 3, 4, 1, 2)).reshape(B, S * S, S, S)
    m = corr.max(axis=1, keepdims=True)
    e = jnp.exp((corr - m) / BETA)
    p = (e / e.sum(axis=1, keepdims=True)).reshape(B, S, S, S, S)   # (B, Hs, Ws, Ht, Wt)
    gx = (p.sum(axis=1) * x_normal[None, :, None, None]).sum(axis=1)
    gy = (p.sum(axis=2) * y_normal[None, :, None, None]).sum(axis=1)
    mapx = (gx + 1.0) * (S - 1) / 2.0
    mapy = (gy + 1.0) * (S - 1) / 2.0
    xx = jnp.arange(S, dtype=jnp.float32)[None, None, :]
    yy = jnp.arange(S, dtype=jnp.float32)[None, :, None]
    return jnp.stack([mapx - xx, mapy - yy], axis=1)                # (B, 2, S, S)


# --------------------------------------------------------------------------------------
if __name__ == "__main__":
    key = jax.random.PRNGKey(0)
    keys = jax.random.split(key, 16)
    B = 2
    inch = (2048, 1024, 512)   # affinity_proj input channels per level (from __init__)
    FH = FW = 8                # small spatial size for the backbone features

    # Aggregated multi-head correlation standing in for corr3 (pre-mean).
    corr_agg = jax.random.normal(keys[0], (B, NHEAD, S, S, S, S), dtype=jnp.float32)

    # Backbone feature stacks; forward() takes x[:, -1] per level.
    target_feats = [jax.random.normal(keys[1 + i], (B, 2, c, FH, FW), jnp.float32) * 0.1
                    for i, c in enumerate(inch)]
    source_feats = [jax.random.normal(keys[4 + i], (B, 2, c, FH, FW), jnp.float32) * 0.1
                    for i, c in enumerate(inch)]

    # Deterministic affinity_proj parameters: Conv2d(c, 128, 3, 2, 1) per level.
    proj_w = [jax.random.normal(keys[7 + i], (128, c, 3, 3), jnp.float32) * 0.02
              for i, c in enumerate(inch)]
    proj_b = [jnp.linspace(-0.1, 0.1, 128, dtype=jnp.float32) for _ in inch]

    # target/source affinity projections: one fused Pallas matmul per level (shared W).
    target_proj, source_proj = [], []
    for lvl in range(3):
        t_p, s_p = affinity_proj_fused(
            [target_feats[lvl][:, -1], source_feats[lvl][:, -1]],
            proj_w[lvl], proj_b[lvl])
        target_proj.append(t_p)
        source_proj.append(s_p)
    # TODO(synk): target_proj / source_proj feed Transformer blocks whose definition is
    # not provided; they are computed but not consumed further here.

    # Soft-argmax flow head (Pallas kernel: mean over heads + softmax + soft-argmax + flow).
    flow = jax.block_until_ready(cats_soft_argmax_flow(corr_agg))

    # ---- correctness checks against pure-JAX references ----
    for y, x, w, b in zip(target_proj + source_proj,
                          [f[:, -1] for f in target_feats + source_feats],
                          proj_w + proj_w, proj_b + proj_b):
        ref = conv_reference(x, w, b)
        assert y.shape == ref.shape == (B, 128, 4, 4)
        assert float(jnp.max(jnp.abs(y - ref))) < 1e-2

    flow_ref = jax.block_until_ready(flow_reference(corr_agg))
    assert flow.shape == (B, 2, S, S)
    assert bool(jnp.all(jnp.isfinite(flow)))
    assert float(jnp.max(jnp.abs(flow - flow_ref))) < 1e-2

    print("KERNEL_OK")
</pallas_src>

<mosaic_0001>
module attributes {stable_mosaic.version = 11 : i64} {
  func.func @conv_mm_kernel(%arg0: i32, %arg1: memref<64x2304xbf16, #tpu.memory_space<vmem>>, %arg2: memref<2304x128xbf16, #tpu.memory_space<vmem>>, %arg3: memref<1x128xf32, #tpu.memory_space<vmem>>, %arg4: memref<64x128xf32, #tpu.memory_space<vmem>>) attributes {dimension_semantics = [#tpu.dimension_semantics<arbitrary>], iteration_bounds = array<i64: 8>, scalar_prefetch = 0 : i64, scratch_operands = 0 : i64, tpu.core_type = #tpu.core_type<tc>, window_params = [{transform_indices = @transform_0, window_bounds = array<i64: 64, 2304>}, {transform_indices = @transform_1, window_bounds = array<i64: 2304, 128>}, {pipeline_mode = #tpu.pipeline_mode<synchronous>, transform_indices = @transform_2, window_bounds = array<i64: 1, 128>}, {pipeline_mode = #tpu.pipeline_mode<synchronous>, transform_indices = @transform_3, window_bounds = array<i64: 64, 128>}]} {
    %c0_i32 = arith.constant 0 : i32
    %0 = arith.cmpi eq, %arg0, %c0_i32 : i32
    %1 = arith.extui %0 : i1 to i32
    %c0_i32_0 = arith.constant 0 : i32
    %2 = arith.cmpi ne, %1, %c0_i32_0 : i32
    scf.if %2 {
      %cst_9 = arith.constant 0.000000e+00 : f32
      %12 = vector.broadcast %cst_9 : f32 to vector<64x128xf32>
      %c0_10 = arith.constant 0 : index
      %c0_11 = arith.constant 0 : index
      %13 = vector.load %arg4[%c0_10, %c0_11] : memref<64x128xf32, #tpu.memory_space<vmem>>, vector<64x128xf32>
      tpu.vector_store %arg4[%c0_10, %c0_11], %12 {strides = array<i32>} : memref<64x128xf32, #tpu.memory_space<vmem>>, vector<64x128xf32>,
    } else {
    }
    %c0 = arith.constant 0 : index
    %c0_1 = arith.constant 0 : index
    %3 = vector.load %arg4[%c0, %c0_1] : memref<64x128xf32, #tpu.memory_space<vmem>>, vector<64x128xf32>
    %c0_2 = arith.constant 0 : index
    %c0_3 = arith.constant 0 : index
    %4 = vector.load %arg1[%c0_2, %c0_3] : memref<64x2304xbf16, #tpu.memory_space<vmem>>, vector<64x2304xbf16>
    %c0_4 = arith.constant 0 : index
    %c0_5 = arith.constant 0 : index
    %5 = vector.load %arg2[%c0_4, %c0_5] : memref<2304x128xbf16, #tpu.memory_space<vmem>>, vector<2304x128xbf16>
    %cst = arith.constant dense<0.000000e+00> : vector<64x128xf32>
    %6 = tpu.matmul %4, %5, %cst {dimension_numbers = #tpu.dot_dimension_numbers<[1], [0], [0], [1], [0, 0, 1, 1], [], []>} : vector<64x2304xbf16>, vector<2304x128xbf16>, vector<64x128xf32> -> vector<64x128xf32>
    %7 = arith.addf %3, %6 : vector<64x128xf32>
    %c0_6 = arith.constant 0 : index
    %c0_7 = arith.constant 0 : index
    %8 = vector.load %arg4[%c0_6, %c0_7] : memref<64x128xf32, #tpu.memory_space<vmem>>, vector<64x128xf32>
    tpu.vector_store %arg4[%c0_6, %c0_7], %7 {strides = array<i32>} : memref<64x128xf32, #tpu.memory_space<vmem>>, vector<64x128xf32>,
    %c7_i32 = arith.constant 7 : i32
    %9 = arith.cmpi eq, %arg0, %c7_i32 : i32
    %10 = arith.extui %9 : i1 to i32
    %c0_i32_8 = arith.constant 0 : i32
    %11 = arith.cmpi ne, %10, %c0_i32_8 : i32
    scf.if %11 {
      %c0_9 = arith.constant 0 : index
      %c0_10 = arith.constant 0 : index
      %12 = vector.load %arg4[%c0_9, %c0_10] : memref<64x128xf32, #tpu.memory_space<vmem>>, vector<64x128xf32>
      %c0_11 = arith.constant 0 : index
      %c0_12 = arith.constant 0 : index
      %13 = vector.load %arg3[%c0_11, %c0_12] : memref<1x128xf32, #tpu.memory_space<vmem>>, vector<1x128xf32>
      %14 = vector.broadcast %13 : vector<1x128xf32> to vector<64x128xf32>
      %15 = arith.addf %12, %14 : vector<64x128xf32>
      %cst_13 = arith.constant 0.000000e+00 : f32
      %16 = vector.broadcast %cst_13 : f32 to vector<64x128xf32>
      %17 = arith.maximumf %15, %16 : vector<64x128xf32>
      %c0_14 = arith.constant 0 : index
      %c0_15 = arith.constant 0 : index
      %18 = vector.load %arg4[%c0_14, %c0_15] : memref<64x128xf32, #tpu.memory_space<vmem>>, vector<64x128xf32>
      tpu.vector_store %arg4[%c0_14, %c0_15], %17 {strides = array<i32>} : memref<64x128xf32, #tpu.memory_space<vmem>>, vector<64x128xf32>,
    } else {
    }
    return
  }
  func.func @transform_0(%arg0: i32) -> (i32, i32) {
    %c0_i32 = arith.constant 0 : i32
    %c0_i32_0 = arith.constant 0 : i32
    return %c0_i32, %arg0 : i32, i32
  }
  func.func @transform_1(%arg0: i32) -> (i32, i32) {
    %c0_i32 = arith.constant 0 : i32
    %c0_i32_0 = arith.constant 0 : i32
    return %arg0, %c0_i32 : i32, i32
  }
  func.func @transform_2(%arg0: i32) -> (i32, i32) {
    %c0_i32 = arith.constant 0 : i32
    %c0_i32_0 = arith.constant 0 : i32
    %c0_i32_1 = arith.constant 0 : i32
    return %c0_i32, %c0_i32_0 : i32, i32
  }
  func.func @transform_3(%arg0: i32) -> (i32, i32) {
    %c0_i32 = arith.constant 0 : i32
    %c0_i32_0 = arith.constant 0 : i32
    %c0_i32_1 = arith.constant 0 : i32
    return %c0_i32, %c0_i32_0 : i32, i32
  }
}

</mosaic_0001>

<bundles_post_ra>
// kernel: tpu_custom_call.1
= control target key start
LH: loop header
LB: loop body
LE: loop exit
PB: predicated region body
PF: predicated region fallthrough
CT: control target
= control target key end

     0   :  { %s4445_s0 = inlined_call_operand.hbm [shape: bf16[64,18432], index: 0, kind: input, shape index: {}]   ;;  %s4446_s1 = inlined_call_operand.hbm [shape: bf16[18432,128], index: 1, kind: input, shape index: {}]   ;;  %s4447_s2 = inlined_call_operand.hbm [shape: f32[1,128], index: 2, kind: input, shape index: {}]   ;;  %s4448_s3 = inlined_call_operand.hbm [shape: f32[64,128], index: 3, kind: output, shape index: {}]  }
   0x1   :  { %4449 = sst [smem:[#allocation13_spill]] %s4445_s0 }
   0x2   :  { %8 = vsyncpa [#allocation3], 0 }
   0x3   :  { %10 = vsyncpa [#allocation3 + $0x1], 0 }
   0x4   :  { %11 = vsyncpa [#allocation6], 0 }
   0x5   :  { %13 = vsyncpa [#allocation6 + $0x1], 0 }
   0x6   :  { %14 = vsyncpa [#allocation4], 0  ;;  %s3895_s12 = smov 0   ;;  %s3897_s13 = smov 0  }
   0x7   :  { %s3899_s14 = smov 0   ;;  %s3901_s15 = smov 0  }
   0x8 LB: > { %s3914_s16 = sadd.s32 4294967295, %s3863_s15   ;;  %s3917_s17 = sadd.s32 1, %s3863_s15   ;;  %s3863_s15 = sphi %s3901_s15, %s4458_s15   ;;  %s3859_s14 = sphi %s3899_s14, %s4457_s14   ;;  %s3855_s13 = sphi %s3897_s13, %s4456_s13   ;;  %s3851_s12 = sphi %s3895_s12, %s4455_s12  }
   0x9   : > { %s24_s18 = ssub.s32 %s3863_s15, %s3917_s17  ;;  %s27_s19 = sadd.s32 1, %s3859_s14 }
   0xa   : > { %p25_p0 = scmp.eq.s32.totalorder %s24_s18, 0  ;;  %p34_p1 = scmp.ne.s32.totalorder %s3859_s14, %s3855_s13 }
   0xb   : > { %p35_p2 = scmp.eq.s32.totalorder %s3863_s15, 0  ;;  %p40_p3 = scmp.ne.s32.totalorder %s3855_s13, %s3851_s12 }
   0xc   : > { %s3927_s20 = scalar_select %p25_p0, %s3859_s14, %s27_s19  }
   0xd   : > { %p3929_p4 = por %p35_p2, %p34_p1  ;;  %p41_p5 = scmp.eq.s32.totalorder %s3914_s16, 0 }
   0xe   : > { %p2513_p6 = scmp.ge.s32.totalorder %s3863_s15, 1  ;;  %p119_p7 = scmp.lt.s32.totalorder %s3863_s15, 9 }
   0xf   : > { %p3938_p8 = por %p41_p5, %p40_p3  ;;  %p2514_p9 = scmp.ne.s32.totalorder %s3914_s16, 0 }
  0x10   : > { %p3943_p10 = pnand %p2513_p6, %p119_p7  ;;  %s131_s26 = sshll.u32 %s4447_s2, 4  ;;  %s132_s26 = int_to_ptr.hbm [resolvable:$true] %s131_s26 }
  0x11   : > { %s3865_s27 = smov [#allocation7]   ;;  %p3652_p13 = scmp.lt.s32.totalorder %s3863_s15, 8 }
  0x12   : > { %p3640_p11 = pneg %p3943_p10  ;;  %s133_s28 = sshll.u32 %s3865_s27, 4  ;;  %s134_s28 = int_to_ptr.vmem [resolvable:$true] %s133_s28 }
  0x13   : > { %s3956_s29 = sand.u32 1, %s3859_s14   ;;  %s3390_s30 = smul.u32 72, %s3863_s15 }
  0x14   : > { %p3641_p12 = pnand %p3640_p11, %p41_p5  ;;  %p3961_p0 = pnand %p3652_p13, %p3929_p4 }
  0x15   : > { %s3624_s5 = smul.u32 576, %s3956_s29  ;;  %s4454_s0 = sld [smem:[#allocation13_spill]] }
  0x16   : > { %3643 = dma.hbm_to_vmem [thread:$0]  (!%p3641_p12), %s132_s26, 16, %s134_s28, [#allocation6]  }
  0x17   : > { %s148_s10 = scalar_lea.vmem [#allocation2], %s3624_s5  ;;  %s145_s12 = scalar_lea.sflag [#allocation3], %s3956_s29 }
  0x18   : > { %s156_s11 = sshll.u32 %s148_s10, 4  ;;  %p3733_p2 = pneg %p3961_p0  ;;  %s157_s11 = int_to_ptr.vmem [resolvable:$true] %s156_s11 }
  0x1b   : > { %s153_s8 = scalar_lea.hbm %s4454_s0, %s3390_s30  ;;  %s3736_s25 = scalar_lea.hbm %s4454_s0, 4608 }
  0x1c   : > { %s154_s9 = sshll.u32 %s153_s8, 4  ;;  %s155_s9 = int_to_ptr.hbm [resolvable:$true] %s154_s9 }
  0x1d   : > { %s3729_s18 = sshra.s32 %s155_s9, 4  ;;  %s3730_s18 = int_to_ptr.hbm [resolvable:$true] %s3729_s18 }
  0x1e   : > { %s3731_s19 = scalar_lea.hbm %s3730_s18, 576  ;;  %p3737_p6 = scmp.lt.s32.totalorder %s3730_s18, %s4454_s0 }
  0x1f   : > { %p3732_p1 = scmp.ne.s32.totalorder %s3730_s18, %s3731_s19  ;;  %p3738_p7 = scmp.lt.s32.totalorder %s3736_s25, %s3731_s19 }
  0x21   : > { %p3734_p3 = pnand %p3733_p2, %p3732_p1  ;;  %p3739_p11 = por %p3738_p7, %p3737_p6 }
  0x23   : > { %p3735_p4 = pneg %p3734_p3 }
  0x25   : > { %p3740_p12 = pnand %p3739_p11, %p3735_p4 }
  0x27   : > { %3743 = shalt.err (!%p3740_p12)
}
  0x28   : > { %s3866_s28 = smov 9216   ;;  %s3867_s30 = smov 1152  }
  0x29   : > { %s3868_s5 = smov 72   ;;  %s166_s6 = sand.u32 1, %s3863_s15  }
  0x2a   : > { %3647 = dma.hbm_to_vmem [thread:$0]  (!%p3961_p0), %s155_s9, 9216, %s157_s11, %s145_s12, %s3866_s28, %s3867_s30, %s3868_s5  }
  0x2b   : > { %s3625_s7 = smul.u32 1152, %s3956_s29  ;;  %s167_s26 = scalar_lea.sflag [#allocation6], %s166_s6 }
  0x2c   : > { %s3391_s8 = smul.u32 1152, %s3863_s15  ;;  %s3766_s9 = scalar_lea.hbm %s4446_s1, 9216 }
  0x2d   : > { %s170_s19 = scalar_lea.vmem [#allocation5], %s3625_s7 }
  0x2e   : > { %s175_s18 = scalar_lea.hbm %s4446_s1, %s3391_s8  ;;  %s178_s24 = sshll.u32 %s170_s19, 4  ;;  %s179_s24 = int_to_ptr.vmem [resolvable:$true] %s178_s24 }
  0x2f   : > { %s176_s25 = sshll.u32 %s175_s18, 4  ;;  %s177_s25 = int_to_ptr.hbm [resolvable:$true] %s176_s25 }
  0x30   : > { %s3759_s27 = sshra.s32 %s177_s25, 4  ;;  %s3760_s27 = int_to_ptr.hbm [resolvable:$true] %s3759_s27 }
  0x31   : > { %s3761_s0 = scalar_lea.hbm %s3760_s27, 1152  ;;  %p3767_p4 = scmp.lt.s32.totalorder %s3760_s27, %s4446_s1 }
  0x32   : > { %p3762_p13 = scmp.ne.s32.totalorder %s3760_s27, %s3761_s0  ;;  %p3768_p6 = scmp.lt.s32.totalorder %s3766_s9, %s3761_s0 }
  0x34   : > { %p3764_p1 = pnand %p3762_p13, %p3733_p2  ;;  %p3769_p7 = por %p3768_p6, %p3767_p4 }
  0x36   : > { %p3765_p3 = pneg %p3764_p1 }
  0x38   : > { %p3770_p11 = pnand %p3769_p7, %p3765_p3 }
  0x3a   : > { %3773 = shalt.err (!%p3770_p11)
}
  0x3b   : > { %s3869_s28 = smov 64   ;;  %s3870_s30 = smov 4  }
  0x3c   : > { %3650 = dma.hbm_to_vmem [thread:$0]  (!%p3961_p0), %s177_s25, 18432, %s179_s24, %s167_s26, %s3869_s28, %s3869_s28, %s3870_s30  }
  0x3d   : > { %190 = sbr.rel (%p3943_p10) target bundleno = 561 (0x231), region = 32  ;;  %s192_s5 = sand.u32 (!%p3943_p10), 1, %s3855_s13  }
  0x3e   : > { %s3626_s6 = smul.u32 (!%p3943_p10), 576, %s192_s5  ;;  %s193_s7 = scalar_lea.sflag (!%p3943_p10), [#allocation3], %s192_s5 }
  0x40   : > { %s4003_s8 = scalar_lea.vmem (!%p3943_p10), [#allocation2], %s3626_s6 }
  0x42   : > { %3834 = dma.done.wait (%p3938_p8), %s193_s7, 9216  }
  0x43   : > { %3836 = vsyncadd (%p3938_p8), %s193_s7, 4294958080  ;;  %s202_s0 = sand.u32 1, %s3914_s16   ;;  %s3627_s4 = smul.u32 1152, %s192_s5 }
  0x44   : > { %s203_s10 = scalar_lea.sflag [#allocation6], %s202_s0 }
  0x45   : > { %s4010_s21 = scalar_lea.vmem [#allocation5], %s3627_s4 }
  0x46   : > { %3838 = dma.done.wait (%p3938_p8), %s203_s10, 18432  }
  0x47   : > { %3840 = vsyncadd (%p3938_p8), %s203_s10, 4294948864 }
  0x48   : > { %3842 = dma.done.wait (%p41_p5), [#allocation6], 16  }
  0x49   : > { %3844 = vsyncadd (%p41_p5), [#allocation6], 4294967280  ;;  %240 = sbr.rel (%p2514_p9) target bundleno = 87 (0x57), region = 48 }
  0x4e   : > { %v3871_v0 = vmov 0.0  }
  0x4f   : > { %241 = vst [vmem:[#allocation8] sm:$0xff] %v3871_v0 }
  0x50   : > { %242 = vst [vmem:[#allocation8 + $0x8] sm:$0xff] %v3871_v0 }
  0x51   : > { %243 = vst [vmem:[#allocation8 + $0x10] sm:$0xff] %v3871_v0 }
  0x52   : > { %244 = vst [vmem:[#allocation8 + $0x18] sm:$0xff] %v3871_v0 }
  0x53   : > { %245 = vst [vmem:[#allocation8 + $0x20] sm:$0xff] %v3871_v0 }
  0x54   : > { %246 = vst [vmem:[#allocation8 + $0x28] sm:$0xff] %v3871_v0 }
  0x55   : > { %247 = vst [vmem:[#allocation8 + $0x30] sm:$0xff] %v3871_v0 }
  0x56   : > { %248 = vst [vmem:[#allocation8 + $0x38] sm:$0xff] %v3871_v0 }
  0x57 PF: > { %v3471_v1 = vld [vmem:[%s4010_s21 + $0x38] sm:$0xff]  ;;  %v3470_v3 = vld [vmem:[%s4010_s21 + $0x30] sm:$0xff]  ;;  %v3469_v5 = vld [vmem:[%s4010_s21 + $0x28] sm:$0xff]  ;;  %p3385_p5 = scmp.ne.s32.totalorder %s3914_s16, 7 }
  0x58   : > { %v3479_v2 = vld [vmem:[%s4010_s21 + $0x78] sm:$0xff]  ;;  %3608 = vmatpush.bf16.msra.mxu2 %v3471_v1  ;;  %v3478_v4 = vld [vmem:[%s4010_s21 + $0x70] sm:$0xff]  ;;  %1841 = vmatpush.bf16.msra.mxu0 %v3471_v1  ;;  %v3477_v6 = vld [vmem:[%s4010_s21 + $0x68] sm:$0xff] }
  0x59   : > { %3616 = vmatpush.bf16.msra.mxu3 %v3479_v2  ;;  %1870 = vmatpush.bf16.msra.mxu1 %v3479_v2  ;;  %v3468_v7 = vld [vmem:[%s4010_s21 + $0x20] sm:$0xff]  ;;  %v3467_v9 = vld [vmem:[%s4010_s21 + $0x18] sm:$0xff]  ;;  %v3466_v11 = vld [vmem:[%s4010_s21 + $0x10] sm:$0xff] }
  0x5a   : > { %v3476_v8 = vld [vmem:[%s4010_s21 + $0x60] sm:$0xff]  ;;  %v3475_v10 = vld [vmem:[%s4010_s21 + $0x58] sm:$0xff]  ;;  %v3474_v12 = vld [vmem:[%s4010_s21 + $0x50] sm:$0xff] }
  0x5b   : > { %v3465_v13 = vld [vmem:[%s4010_s21 + $0x8] sm:$0xff]  ;;  %v3464_v15 = vld [vmem:[%s4010_s21] sm:$0xff]  ;;  %v3487_v25 = vld [vmem:[%s4010_s21 + $0xb8] sm:$0xff] }
  0x5c   : > { %3609 = vmatpush.bf16.msra.mxu2 %v3470_v3  ;;  %1842 = vmatpush.bf16.msra.mxu0 %v3470_v3  ;;  %v3473_v14 = vld [vmem:[%s4010_s21 + $0x48] sm:$0xff]  ;;  %v3472_v16 = vld [vmem:[%s4010_s21 + $0x40] sm:$0xff]  ;;  %v3495_v26 = vld [vmem:[%s4010_s21 + $0xf8] sm:$0xff] }
  0x5d   : > { %3617 = vmatpush.bf16.msra.mxu3 %v3478_v4  ;;  %1871 = vmatpush.bf16.msra.mxu1 %v3478_v4  ;;  %v2667_v17 = vld [vmem:[%s4003_s8 + $0x120] sm:$0xf]  ;;  %v3437_v18 = vld [vmem:[%s4003_s8 + $0x164] sm:$0xf0]  ;;  %v3428_v19 = vld [vmem:[%s4003_s8 + $0x124] sm:$0xf] }
  0x5e   : > { %v2669_v20 = vld [vmem:[%s4003_s8 + $0x168] sm:$0xf0]  ;;  %v2523_v21 = vld [vmem:[%s4003_s8] sm:$0xf]  ;;  %v3401_v22 = vld [vmem:[%s4003_s8 + $0x44] sm:$0xf0]  ;;  %v2668_v27 = vor.u32 %v3437_v18, %v2667_v17 }
  0x5f   : > { %v3392_v23 = vld [vmem:[%s4003_s8 + $0x4] sm:$0xf]  ;;  %v2525_v24 = vld [vmem:[%s4003_s8 + $0x48] sm:$0xf0]  ;;  %v2672_v28 = vor.u32 %v3428_v19, %v2669_v20  ;;  %v2524_v29 = vor.u32 %v3401_v22, %v2523_v21  ;;  %v3503_v31 = vld [vmem:[%s4010_s21 + $0x138] sm:$0xff] }
  0x60   : > { %3610 = vmatpush.bf16.msra.mxu2 %v3469_v5  ;;  %1843 = vmatpush.bf16.msra.mxu0 %v3469_v5  ;;  %v2528_v30 = vor.u32 %v3392_v23, %v2525_v24  ;;  %v3511_v32 = vld [vmem:[%s4010_s21 + $0x178] sm:$0xff]  ;;  %v3486_v33 = vld [vmem:[%s4010_s21 + $0xb0] sm:$0xff]  ;;  %v3485_v37 = vld [vmem:[%s4010_s21 + $0xa8] sm:$0xff] }
  0x61   : > { %3618 = vmatpush.bf16.msra.mxu3 %v3477_v6  ;;  %1872 = vmatpush.bf16.msra.mxu1 %v3477_v6  ;;  %v3494_v34 = vld [vmem:[%s4010_s21 + $0xf0] sm:$0xff]  ;;  %v3493_v38 = vld [vmem:[%s4010_s21 + $0xe8] sm:$0xff]  ;;  %v3484_v41 = vld [vmem:[%s4010_s21 + $0xa0] sm:$0xff] }
  0x62   : > { %v3502_v35 = vld [vmem:[%s4010_s21 + $0x130] sm:$0xff]  ;;  %v3501_v39 = vld [vmem:[%s4010_s21 + $0x128] sm:$0xff]  ;;  %v3492_v42 = vld [vmem:[%s4010_s21 + $0xe0] sm:$0xff] }
  0x63   : > { %v3510_v36 = vld [vmem:[%s4010_s21 + $0x170] sm:$0xff]  ;;  %v3509_v40 = vld [vmem:[%s4010_s21 + $0x168] sm:$0xff]  ;;  %v3500_v43 = vld [vmem:[%s4010_s21 + $0x120] sm:$0xff] }
  0x64   : > { %3611 = vmatpush.bf16.msra.mxu2 %v3468_v7  ;;  %1844 = vmatpush.bf16.msra.mxu0 %v3468_v7  ;;  %v2739_v44 = vld [vmem:[%s4003_s8 + $0x1b0] sm:$0xf]  ;;  %v3455_v45 = vld [vmem:[%s4003_s8 + $0x1f4] sm:$0xf0]  ;;  %v3446_v46 = vld [vmem:[%s4003_s8 + $0x1b4] sm:$0xf] }
  0x65   : > { %3619 = vmatpush.bf16.msra.mxu3 %v3476_v8  ;;  %1873 = vmatpush.bf16.msra.mxu1 %v3476_v8  ;;  %v2741_v47 = vld [vmem:[%s4003_s8 + $0x1f8] sm:$0xf0]  ;;  %v3508_v48 = vld [vmem:[%s4010_s21 + $0x160] sm:$0xff]  ;;  %v2595_v49 = vld [vmem:[%s4003_s8 + $0x90] sm:$0xf]  ;;  %v2740_v55 = vor.u32 %v3455_v45, %v2739_v44 }
  0x66   : > { %v3419_v50 = vld [vmem:[%s4003_s8 + $0xd4] sm:$0xf0]  ;;  %v3410_v51 = vld [vmem:[%s4003_s8 + $0x94] sm:$0xf]  ;;  %v2597_v52 = vld [vmem:[%s4003_s8 + $0xd8] sm:$0xf0]  ;;  %v2744_v56 = vor.u32 %v3446_v46, %v2741_v47 }
  0x67   : > { %v3483_v53 = vld [vmem:[%s4010_s21 + $0x98] sm:$0xff]  ;;  %v2596_v57 = vor.u32 %v3419_v50, %v2595_v49  ;;  %v2600_v58 = vor.u32 %v3410_v51, %v2597_v52  ;;  %v3482_v61 = vld [vmem:[%s4010_s21 + $0x90] sm:$0xff]  ;;  %v3481_v1 = vld [vmem:[%s4010_s21 + $0x88] sm:$0xff] }
  0x68   : > { %3612 = vmatpush.bf16.msra.mxu2 %v3467_v9  ;;  %1845 = vmatpush.bf16.msra.mxu0 %v3467_v9  ;;  %v3491_v54 = vld [vmem:[%s4010_s21 + $0xd8] sm:$0xff]  ;;  %v3490_v62 = vld [vmem:[%s4010_s21 + $0xd0] sm:$0xff]  ;;  %v3489_v2 = vld [vmem:[%s4010_s21 + $0xc8] sm:$0xff] }
  0x69   : > { %3620 = vmatpush.bf16.msra.mxu3 %v3475_v10  ;;  %1874 = vmatpush.bf16.msra.mxu1 %v3475_v10  ;;  %v3499_v59 = vld [vmem:[%s4010_s21 + $0x118] sm:$0xff]  ;;  %v3498_v63 = vld [vmem:[%s4010_s21 + $0x110] sm:$0xff]  ;;  %v3497_v3 = vld [vmem:[%s4010_s21 + $0x108] sm:$0xff] }
  0x6a   : > { %v3507_v60 = vld [vmem:[%s4010_s21 + $0x158] sm:$0xff]  ;;  %v3506_v0 = vld [vmem:[%s4010_s21 + $0x150] sm:$0xff]  ;;  %v3480_v4 = vld [vmem:[%s4010_s21 + $0x80] sm:$0xff] }
  0x6b   : > { %v3505_v5 = vld [vmem:[%s4010_s21 + $0x148] sm:$0xff]  ;;  %v3488_v6 = vld [vmem:[%s4010_s21 + $0xc0] sm:$0xff]  ;;  %v3402_v8 = vld [vmem:[%s4003_s8 + $0x4c] sm:$0xf0] }
  0x6c   : > { %3613 = vmatpush.bf16.msra.mxu2 %v3466_v11  ;;  %1846 = vmatpush.bf16.msra.mxu0 %v3466_v11  ;;  %v2531_v7 = vld [vmem:[%s4003_s8 + $0x8] sm:$0xf]  ;;  %v3496_v9 = vld [vmem:[%s4010_s21 + $0x100] sm:$0xff]  ;;  %v3393_v10 = vld [vmem:[%s4003_s8 + $0xc] sm:$0xf] }
  0x6d   : > { %3621 = vmatpush.bf16.msra.mxu3 %v3474_v12  ;;  %1875 = vmatpush.bf16.msra.mxu1 %v3474_v12  ;;  %v3519_v11 = vld [vmem:[%s4010_s21 + $0x1b8] sm:$0xff]  ;;  %v3394_v17 = vld [vmem:[%s4003_s8 + $0x14] sm:$0xf]  ;;  %v2532_v21 = vor.u32 %v3402_v8, %v2531_v7  ;;  %v2613_v44 = vld [vmem:[%s4003_s8 + $0xe8] sm:$0xf0] }
  0x6e   : > { %v3527_v12 = vld [vmem:[%s4010_s21 + $0x1f8] sm:$0xff] }
  0x6f   : > { %v2541_v18 = vld [vmem:[%s4003_s8 + $0x58] sm:$0xf0] }
  0x70   : > { %3614 = vmatpush.bf16.msra.mxu2 %v3465_v13  ;;  %1847 = vmatpush.bf16.msra.mxu0 %v3465_v13  ;;  %v2533_v13 = vld [vmem:[%s4003_s8 + $0x50] sm:$0xf0]  ;;  %v3535_v19 = vld [vmem:[%s4010_s21 + $0x238] sm:$0xff]  ;;  %v2544_v24 = vor.u32 %v3394_v17, %v2541_v18 }
  0x71   : > { %3622 = vmatpush.bf16.msra.mxu3 %v3473_v14  ;;  %1876 = vmatpush.bf16.msra.mxu1 %v3473_v14  ;;  %v3504_v14 = vld [vmem:[%s4010_s21 + $0x140] sm:$0xff]  ;;  %v3543_v20 = vld [vmem:[%s4010_s21 + $0x278] sm:$0xff]  ;;  %v2536_v22 = vor.u32 %v3393_v10, %v2533_v13  ;;  %v3558_v17 = vld [vmem:[%s4010_s21 + $0x2f0] sm:$0xff] }
  0x72   : > { %v3515_v45 = vld [vmem:[%s4010_s21 + $0x198] sm:$0xff] }
  0x73   : > { %v3523_v46 = vld [vmem:[%s4010_s21 + $0x1d8] sm:$0xff] }
  0x74   : > { %3615 = vmatpush.bf16.msra.mxu2 %v3464_v15  ;;  %1848 = vmatpush.bf16.msra.mxu0 %v3464_v15  ;;  %v2539_v15 = vld [vmem:[%s4003_s8 + $0x10] sm:$0xf]  ;;  %v3531_v47 = vld [vmem:[%s4010_s21 + $0x218] sm:$0xff] }
  0x75   : > { %3623 = vmatpush.bf16.msra.mxu3 %v3472_v16  ;;  %1877 = vmatpush.bf16.msra.mxu1 %v3472_v16  ;;  %v3403_v16 = vld [vmem:[%s4003_s8 + $0x54] sm:$0xf0]  ;;  %v2685_v7 = vld [vmem:[%s4003_s8 + $0x178] sm:$0xf0] }
  0x76   : > { %v2540_v23 = vor.u32 %v3403_v16, %v2539_v15  ;;  %v3551_v13 = vld [vmem:[%s4010_s21 + $0x2b8] sm:$0xff]  ;;  %v3550_v15 = vld [vmem:[%s4010_s21 + $0x2b0] sm:$0xff] }
  0x77   : > { %1859 = vmatmul.bf16.vlgmr.msra.gmra.mxu2 %v2668_v27  ;;  %1849 = vmatmul.bf16.vlgmr.msra.gmra.mxu0 %v2524_v29  ;;  %v3534_v27 = vld [vmem:[%s4010_s21 + $0x230] sm:$0xff]  ;;  %v3517_v29 = vld [vmem:[%s4010_s21 + $0x1a8] sm:$0xff]  ;;  %v3567_v16 = vld [vmem:[%s4010_s21 + $0x338] sm:$0xff] }
  0x78   : > { %1899 = vmatpush.bf16.msrb.mxu2 %v3487_v25  ;;  %1888 = vmatmul.bf16.vlgmr.msra.gmra.mxu3 %v2672_v28  ;;  %v3518_v25 = vld [vmem:[%s4010_s21 + $0x1b0] sm:$0xff]  ;;  %v3575_v18 = vld [vmem:[%s4010_s21 + $0x378] sm:$0xff] }
  0x79   : > { %1928 = vmatpush.bf16.msrb.mxu3 %v3495_v26  ;;  %1878 = vmatmul.bf16.vlgmr.msra.gmra.mxu1 %v2528_v30  ;;  %v3526_v26 = vld [vmem:[%s4010_s21 + $0x1f0] sm:$0xff]  ;;  %v3525_v30 = vld [vmem:[%s4010_s21 + $0x1e8] sm:$0xff] }
  0x7a   : > { %1957 = vmatpush.bf16.msrb.mxu0 %v3503_v31  ;;  %1986 = vmatpush.bf16.msrb.mxu1 %v3511_v32  ;;  %v3542_v28 = vld [vmem:[%s4010_s21 + $0x270] sm:$0xff]  ;;  %v3533_v31 = vld [vmem:[%s4010_s21 + $0x228] sm:$0xff] }
  0x7b   : > { %v3541_v32 = vld [vmem:[%s4010_s21 + $0x268] sm:$0xff] }
  0x7c   : > { %1900 = vmatpush.bf16.msrb.mxu2 %v3486_v33  ;;  %v3516_v33 = vld [vmem:[%s4010_s21 + $0x1a0] sm:$0xff] }
  0x7d   : > { %1929 = vmatpush.bf16.msrb.mxu3 %v3494_v34  ;;  %v3524_v34 = vld [vmem:[%s4010_s21 + $0x1e0] sm:$0xff] }
  0x7e   : > { %1958 = vmatpush.bf16.msrb.mxu0 %v3502_v35  ;;  %1987 = vmatpush.bf16.msrb.mxu1 %v3510_v36  ;;  %v2603_v35 = vld [vmem:[%s4003_s8 + $0x98] sm:$0xf]  ;;  %v3532_v36 = vld [vmem:[%s4010_s21 + $0x220] sm:$0xff] }
  0x80   : > { %1901 = vmatpush.bf16.msrb.mxu2 %v3485_v37  ;;  %v3540_v37 = vld [vmem:[%s4010_s21 + $0x260] sm:$0xff] }
  0x81   : > { %1930 = vmatpush.bf16.msrb.mxu3 %v3493_v38  ;;  %v3420_v38 = vld [vmem:[%s4003_s8 + $0xdc] sm:$0xf0] }
  0x82   : > { %1959 = vmatpush.bf16.msrb.mxu0 %v3501_v39  ;;  %1988 = vmatpush.bf16.msrb.mxu1 %v3509_v40  ;;  %v3411_v39 = vld [vmem:[%s4003_s8 + $0x9c] sm:$0xf]  ;;  %v2605_v40 = vld [vmem:[%s4003_s8 + $0xe0] sm:$0xf0]  ;;  %v2604_v49 = vor.u32 %v3420_v38, %v2603_v35  ;;  %v3573_v38 = vld [vmem:[%s4010_s21 + $0x368] sm:$0xff] }
  0x83   : > { %v2608_v50 = vor.u32 %v3411_v39, %v2605_v40  ;;  %v3548_v35 = vld [vmem:[%s4010_s21 + $0x2a0] sm:$0xff]  ;;  %v2547_v39 = vld [vmem:[%s4003_s8 + $0x18] sm:$0xf] }
  0x84   : > { %1902 = vmatpush.bf16.msrb.mxu2 %v3484_v41  ;;  %v2611_v41 = vld [vmem:[%s4003_s8 + $0xa0] sm:$0xf] }
  0x85   : > { %1931 = vmatpush.bf16.msrb.mxu3 %v3492_v42  ;;  %v3421_v42 = vld [vmem:[%s4003_s8 + $0xe4] sm:$0xf0]  ;;  %v3404_v40 = vld [vmem:[%s4003_s8 + $0x5c] sm:$0xf0] }
  0x86   : > { %1960 = vmatpush.bf16.msrb.mxu0 %v3500_v43  ;;  %1989 = vmatpush.bf16.msrb.mxu1 %v3508_v48  ;;  %v3412_v43 = vld [vmem:[%s4003_s8 + $0xa4] sm:$0xf]  ;;  %v3539_v48 = vld [vmem:[%s4010_s21 + $0x258] sm:$0xff]  ;;  %v2612_v51 = vor.u32 %v3421_v42, %v2611_v41 }
  0x87   : > { %1864 = vmatmul.bf16.gmra.mxu2 %v2740_v55  ;;  %1854 = vmatmul.bf16.gmra.mxu0 %v2596_v57  ;;  %v2616_v52 = vor.u32 %v3412_v43, %v2613_v44  ;;  %v3530_v55 = vld [vmem:[%s4010_s21 + $0x210] sm:$0xff]  ;;  %v3521_v57 = vld [vmem:[%s4010_s21 + $0x1c8] sm:$0xff]  ;;  %v3395_v41 = vld [vmem:[%s4003_s8 + $0x1c] sm:$0xf] }
  0x88   : > { %1903 = vmatpush.bf16.msrb.mxu2 %v3483_v53  ;;  %1893 = vmatmul.bf16.gmra.mxu3 %v2744_v56  ;;  %v3514_v53 = vld [vmem:[%s4010_s21 + $0x190] sm:$0xff]  ;;  %v3513_v56 = vld [vmem:[%s4010_s21 + $0x188] sm:$0xff]  ;;  %v2549_v42 = vld [vmem:[%s4003_s8 + $0x60] sm:$0xf0] }
  0x89   : > { %1932 = vmatpush.bf16.msrb.mxu3 %v3491_v54  ;;  %1883 = vmatmul.bf16.gmra.mxu1 %v2600_v58  ;;  %v3522_v54 = vld [vmem:[%s4010_s21 + $0x1d0] sm:$0xff]  ;;  %v2555_v43 = vld [vmem:[%s4003_s8 + $0x20] sm:$0xf]  ;;  %v3405_v44 = vld [vmem:[%s4003_s8 + $0x64] sm:$0xf0] }
  0x8a   : > { %1961 = vmatpush.bf16.msrb.mxu0 %v3499_v59  ;;  %1990 = vmatpush.bf16.msrb.mxu1 %v3507_v60  ;;  %v3538_v58 = vld [vmem:[%s4010_s21 + $0x250] sm:$0xff]  ;;  %v3529_v59 = vld [vmem:[%s4010_s21 + $0x208] sm:$0xff] }
  0x8b   : > { %v3537_v60 = vld [vmem:[%s4010_s21 + $0x248] sm:$0xff] }
  0x8c   : > { %1904 = vmatpush.bf16.msrb.mxu2 %v3482_v61  ;;  %v3512_v61 = vld [vmem:[%s4010_s21 + $0x180] sm:$0xff] }
  0x8d   : > { %1933 = vmatpush.bf16.msrb.mxu3 %v3490_v62  ;;  %v3520_v62 = vld [vmem:[%s4010_s21 + $0x1c0] sm:$0xff] }
  0x8e   : > { %1962 = vmatpush.bf16.msrb.mxu0 %v3498_v63  ;;  %1991 = vmatpush.bf16.msrb.mxu1 %v3506_v0  ;;  %v3528_v63 = vld [vmem:[%s4010_s21 + $0x200] sm:$0xff]  ;;  %v2675_v0 = vld [vmem:[%s4003_s8 + $0x128] sm:$0xf] }
  0x90   : > { %1905 = vmatpush.bf16.msrb.mxu2 %v3481_v1  ;;  %v3438_v1 = vld [vmem:[%s4003_s8 + $0x16c] sm:$0xf0] }
  0x91   : > { %1934 = vmatpush.bf16.msrb.mxu3 %v3489_v2  ;;  %v3429_v2 = vld [vmem:[%s4003_s8 + $0x12c] sm:$0xf]  ;;  %v2676_v8 = vor.u32 %v3438_v1, %v2675_v0  ;;  %v3414_v0 = vld [vmem:[%s4003_s8 + $0xb4] sm:$0xf]  ;;  %v2629_v1 = vld [vmem:[%s4003_s8 + $0xf8] sm:$0xf0] }
  0x92   : > { %1963 = vmatpush.bf16.msrb.mxu0 %v3497_v3  ;;  %1992 = vmatpush.bf16.msrb.mxu1 %v3505_v5  ;;  %v2677_v3 = vld [vmem:[%s4003_s8 + $0x170] sm:$0xf0]  ;;  %v3439_v5 = vld [vmem:[%s4003_s8 + $0x174] sm:$0xf0] }
  0x94   : > { %1906 = vmatpush.bf16.msrb.mxu2 %v3480_v4  ;;  %v2683_v4 = vld [vmem:[%s4003_s8 + $0x130] sm:$0xf] }
  0x95   : > { %1935 = vmatpush.bf16.msrb.mxu3 %v3488_v6  ;;  %v3430_v6 = vld [vmem:[%s4003_s8 + $0x134] sm:$0xf]  ;;  %v2684_v10 = vor.u32 %v3439_v5, %v2683_v4  ;;  %v3571_v4 = vld [vmem:[%s4010_s21 + $0x358] sm:$0xff] }
  0x96   : > { %1964 = vmatpush.bf16.msrb.mxu0 %v3496_v9  ;;  %1993 = vmatpush.bf16.msrb.mxu1 %v3504_v14  ;;  %v2680_v9 = vor.u32 %v3429_v2, %v2677_v3  ;;  %v3559_v14 = vld [vmem:[%s4010_s21 + $0x2f8] sm:$0xff] }
  0x97   : > { %1907 = vmatmul.bf16.vlgmr.msrb.gmra.mxu2 %v2532_v21  ;;  %v3447_v21 = vld [vmem:[%s4003_s8 + $0x1bc] sm:$0xf] }
  0x98   : > { %2015 = vmatpush.bf16.msra.mxu2 %v3519_v11  ;;  %1936 = vmatmul.bf16.vlgmr.msrb.gmra.mxu3 %v2536_v22  ;;  %v2688_v11 = vor.u32 %v3430_v6, %v2685_v7  ;;  %v2749_v22 = vld [vmem:[%s4003_s8 + $0x200] sm:$0xf0]  ;;  %v2632_v6 = vor.u32 %v3414_v0, %v2629_v1  ;;  %v3545_v7 = vld [vmem:[%s4010_s21 + $0x288] sm:$0xff]  ;;  %v3598_v0 = vld [vmem:[%s4010_s21 + $0x430] sm:$0xff] }
  0x99   : > { %2044 = vmatpush.bf16.msra.mxu3 %v3527_v12  ;;  %1965 = vmatmul.bf16.vlgmr.msrb.gmra.mxu0 %v2540_v23  ;;  %v3536_v12 = vld [vmem:[%s4010_s21 + $0x240] sm:$0xff] }
  0x9a   : > { %2073 = vmatpush.bf16.msra.mxu0 %v3535_v19  ;;  %2102 = vmatpush.bf16.msra.mxu1 %v3543_v20  ;;  %v2747_v19 = vld [vmem:[%s4003_s8 + $0x1b8] sm:$0xf]  ;;  %v3456_v20 = vld [vmem:[%s4003_s8 + $0x1fc] sm:$0xf0] }
  0x9b   : > { %1994 = vmatmul.bf16.vlgmr.msrb.gmra.mxu1 %v2544_v24  ;;  %v2755_v23 = vld [vmem:[%s4003_s8 + $0x1c0] sm:$0xf]  ;;  %v3457_v24 = vld [vmem:[%s4003_s8 + $0x204] sm:$0xf0] }
  0x9c   : > { %2016 = vmatpush.bf16.msra.mxu2 %v3518_v25  ;;  %v3448_v25 = vld [vmem:[%s4003_s8 + $0x1c4] sm:$0xf] }
  0x9d   : > { %2045 = vmatpush.bf16.msra.mxu3 %v3526_v26  ;;  %v2757_v26 = vld [vmem:[%s4003_s8 + $0x208] sm:$0xf0] }
  0x9e   : > { %2074 = vmatpush.bf16.msra.mxu0 %v3534_v27  ;;  %2103 = vmatpush.bf16.msra.mxu1 %v3542_v28  ;;  %v2748_v27 = vor.u32 %v3456_v20, %v2747_v19  ;;  %v2752_v28 = vor.u32 %v3447_v21, %v2749_v22  ;;  %v3441_v19 = vld [vmem:[%s4003_s8 + $0x184] sm:$0xf0]  ;;  %v3432_v20 = vld [vmem:[%s4003_s8 + $0x144] sm:$0xf]  ;;  %v2701_v21 = vld [vmem:[%s4003_s8 + $0x188] sm:$0xf0] }
  0x9f   : > { %v3569_v22 = vld [vmem:[%s4010_s21 + $0x348] sm:$0xff] }
  0xa0   : > { %2017 = vmatpush.bf16.msra.mxu2 %v3517_v29  ;;  %v2756_v29 = vor.u32 %v3457_v24, %v2755_v23 }
  0xa1   : > { %2046 = vmatpush.bf16.msra.mxu3 %v3525_v30  ;;  %v2760_v30 = vor.u32 %v3448_v25, %v2757_v26  ;;  %v2704_v26 = vor.u32 %v3432_v20, %v2701_v21 }
  0xa2   : > { %2075 = vmatpush.bf16.msra.mxu0 %v3533_v31  ;;  %2104 = vmatpush.bf16.msra.mxu1 %v3541_v32  ;;  %v3549_v31 = vld [vmem:[%s4010_s21 + $0x2a8] sm:$0xff] }
  0xa3   : > { %v3557_v32 = vld [vmem:[%s4010_s21 + $0x2e8] sm:$0xff] }
  0xa4   : > { %2018 = vmatpush.bf16.msra.mxu2 %v3516_v33  ;;  %v3566_v33 = vld [vmem:[%s4010_s21 + $0x330] sm:$0xff] }
  0xa5   : > { %2047 = vmatpush.bf16.msra.mxu3 %v3524_v34  ;;  %v3574_v34 = vld [vmem:[%s4010_s21 + $0x370] sm:$0xff] }
  0xa6   : > { %2076 = vmatpush.bf16.msra.mxu0 %v3532_v36  ;;  %2105 = vmatpush.bf16.msra.mxu1 %v3540_v37  ;;  %v3556_v36 = vld [vmem:[%s4010_s21 + $0x2e0] sm:$0xff]  ;;  %v3565_v37 = vld [vmem:[%s4010_s21 + $0x328] sm:$0xff] }
  0xa7   : > { %1912 = vmatmul.bf16.gmra.mxu2 %v2604_v49  ;;  %v2556_v49 = vor.u32 %v3405_v44, %v2555_v43  ;;  %v3590_v43 = vld [vmem:[%s4010_s21 + $0x3f0] sm:$0xff]  ;;  %v3599_v44 = vld [vmem:[%s4010_s21 + $0x438] sm:$0xff] }
  0xa8   : > { %2019 = vmatpush.bf16.msra.mxu2 %v3515_v45  ;;  %1941 = vmatmul.bf16.gmra.mxu3 %v2608_v50  ;;  %v3396_v45 = vld [vmem:[%s4003_s8 + $0x24] sm:$0xf] }
  0xa9   : > { %2048 = vmatpush.bf16.msra.mxu3 %v3523_v46  ;;  %1970 = vmatmul.bf16.gmra.mxu0 %v2612_v51  ;;  %v2557_v46 = vld [vmem:[%s4003_s8 + $0x68] sm:$0xf0]  ;;  %v3547_v51 = vld [vmem:[%s4010_s21 + $0x298] sm:$0xff] }
  0xaa   : > { %2077 = vmatpush.bf16.msra.mxu0 %v3531_v47  ;;  %2106 = vmatpush.bf16.msra.mxu1 %v3539_v48  ;;  %v2548_v47 = vor.u32 %v3404_v40, %v2547_v39  ;;  %v2552_v48 = vor.u32 %v3395_v41, %v2549_v42  ;;  %v2560_v50 = vor.u32 %v3396_v45, %v2557_v46  ;;  %v2763_v40 = vld [vmem:[%s4003_s8 + $0x1c8] sm:$0xf]  ;;  %v3458_v41 = vld [vmem:[%s4003_s8 + $0x20c] sm:$0xf0]  ;;  %v3449_v45 = vld [vmem:[%s4003_s8 + $0x1cc] sm:$0xf] }
  0xab   : > { %1999 = vmatmul.bf16.gmra.mxu1 %v2616_v52  ;;  %v3555_v52 = vld [vmem:[%s4010_s21 + $0x2d8] sm:$0xff]  ;;  %v3582_v42 = vld [vmem:[%s4010_s21 + $0x3b0] sm:$0xff] }
  0xac   : > { %2020 = vmatpush.bf16.msra.mxu2 %v3514_v53  ;;  %v3564_v53 = vld [vmem:[%s4010_s21 + $0x320] sm:$0xff]  ;;  %v2765_v46 = vld [vmem:[%s4003_s8 + $0x210] sm:$0xf0] }
  0xad   : > { %2049 = vmatpush.bf16.msra.mxu3 %v3522_v54  ;;  %v3572_v54 = vld [vmem:[%s4010_s21 + $0x360] sm:$0xff] }
  0xae   : > { %2078 = vmatpush.bf16.msra.mxu0 %v3530_v55  ;;  %2107 = vmatpush.bf16.msra.mxu1 %v3538_v58  ;;  %v3546_v55 = vld [vmem:[%s4010_s21 + $0x290] sm:$0xff]  ;;  %v2619_v58 = vld [vmem:[%s4003_s8 + $0xa8] sm:$0xf] }
  0xb0   : > { %2021 = vmatpush.bf16.msra.mxu2 %v3513_v56  ;;  %v3554_v56 = vld [vmem:[%s4010_s21 + $0x2d0] sm:$0xff] }
  0xb1   : > { %2050 = vmatpush.bf16.msra.mxu3 %v3521_v57  ;;  %v3563_v57 = vld [vmem:[%s4010_s21 + $0x318] sm:$0xff] }
  0xb2   : > { %2079 = vmatpush.bf16.msra.mxu0 %v3529_v59  ;;  %2108 = vmatpush.bf16.msra.mxu1 %v3537_v60  ;;  %v3422_v59 = vld [vmem:[%s4003_s8 + $0xec] sm:$0xf0]  ;;  %v3413_v60 = vld [vmem:[%s4003_s8 + $0xac] sm:$0xf] }
  0xb3   : > { %v2620_v2 = vor.u32 %v3422_v59, %v2619_v58 }
  0xb4   : > { %2022 = vmatpush.bf16.msra.mxu2 %v3512_v61  ;;  %v2621_v61 = vld [vmem:[%s4003_s8 + $0xf0] sm:$0xf0] }
  0xb5   : > { %2051 = vmatpush.bf16.msra.mxu3 %v3520_v62  ;;  %v2627_v62 = vld [vmem:[%s4003_s8 + $0xb0] sm:$0xf]  ;;  %v2624_v3 = vor.u32 %v3413_v60, %v2621_v61  ;;  %v3607_v61 = vld [vmem:[%s4010_s21 + $0x478] sm:$0xff] }
  0xb6   : > { %2080 = vmatpush.bf16.msra.mxu0 %v3528_v63  ;;  %2109 = vmatpush.bf16.msra.mxu1 %v3536_v12  ;;  %v3423_v63 = vld [vmem:[%s4003_s8 + $0xf4] sm:$0xf0]  ;;  %v3552_v12 = vld [vmem:[%s4010_s21 + $0x2c0] sm:$0xff] }
  0xb7   : > { %1917 = vmatmul.bf16.gmra.mxu2 %v2676_v8  ;;  %v2628_v5 = vor.u32 %v3423_v63, %v2627_v62  ;;  %v3553_v8 = vld [vmem:[%s4010_s21 + $0x2c8] sm:$0xff] }
  0xb8   : > { %1946 = vmatmul.bf16.gmra.mxu3 %v2680_v9  ;;  %2131 = vmatpush.bf16.msrb.mxu2 %v3551_v13  ;;  %v3562_v9 = vld [vmem:[%s4010_s21 + $0x310] sm:$0xff]  ;;  %v3561_v13 = vld [vmem:[%s4010_s21 + $0x308] sm:$0xff] }
  0xb9   : > { %1975 = vmatmul.bf16.gmra.mxu0 %v2684_v10  ;;  %2160 = vmatpush.bf16.msrb.mxu3 %v3559_v14  ;;  %v3570_v10 = vld [vmem:[%s4010_s21 + $0x350] sm:$0xff]  ;;  %v2691_v14 = vld [vmem:[%s4003_s8 + $0x138] sm:$0xf]  ;;  %v3581_v62 = vld [vmem:[%s4010_s21 + $0x3a8] sm:$0xff] }
  0xba   : > { %2189 = vmatpush.bf16.msrb.mxu0 %v3567_v16  ;;  %2218 = vmatpush.bf16.msrb.mxu1 %v3575_v18  ;;  %v3431_v16 = vld [vmem:[%s4003_s8 + $0x13c] sm:$0xf]  ;;  %v2699_v18 = vld [vmem:[%s4003_s8 + $0x140] sm:$0xf]  ;;  %v3589_v63 = vld [vmem:[%s4010_s21 + $0x3e8] sm:$0xff] }
  0xbb   : > { %2004 = vmatmul.bf16.gmra.mxu1 %v2688_v11  ;;  %v3544_v11 = vld [vmem:[%s4010_s21 + $0x280] sm:$0xff]  ;;  %v2700_v25 = vor.u32 %v3441_v19, %v2699_v18  ;;  %v2573_v18 = vld [vmem:[%s4003_s8 + $0x78] sm:$0xf0] }
  0xbc   : > { %2132 = vmatpush.bf16.msrb.mxu2 %v3550_v15  ;;  %v3440_v15 = vld [vmem:[%s4003_s8 + $0x17c] sm:$0xf0] }
  0xbd   : > { %2161 = vmatpush.bf16.msrb.mxu3 %v3558_v17  ;;  %v2693_v17 = vld [vmem:[%s4003_s8 + $0x180] sm:$0xf0]  ;;  %v2692_v23 = vor.u32 %v3440_v15, %v2691_v14  ;;  %v2571_v14 = vld [vmem:[%s4003_s8 + $0x30] sm:$0xf]  ;;  %v3597_v15 = vld [vmem:[%s4010_s21 + $0x428] sm:$0xff] }
  0xbe   : > { %2190 = vmatpush.bf16.msrb.mxu0 %v3566_v33  ;;  %2219 = vmatpush.bf16.msrb.mxu1 %v3574_v34  ;;  %v2696_v24 = vor.u32 %v3431_v16, %v2693_v17  ;;  %v3591_v33 = vld [vmem:[%s4010_s21 + $0x3f8] sm:$0xff]  ;;  %v3398_v17 = vld [vmem:[%s4003_s8 + $0x34] sm:$0xf] }
  0xbf   : > { %v3407_v16 = vld [vmem:[%s4003_s8 + $0x74] sm:$0xf0] }
  0xc0   : > { %2133 = vmatpush.bf16.msrb.mxu2 %v3549_v31  ;;  %v3568_v31 = vld [vmem:[%s4010_s21 + $0x340] sm:$0xff] }
  0xc1   : > { %2162 = vmatpush.bf16.msrb.mxu3 %v3557_v32  ;;  %v3583_v32 = vld [vmem:[%s4010_s21 + $0x3b8] sm:$0xff] }
  0xc2   : > { %2191 = vmatpush.bf16.msrb.mxu0 %v3565_v37  ;;  %2220 = vmatpush.bf16.msrb.mxu1 %v3573_v38 }
  0xc4   : > { %2134 = vmatpush.bf16.msrb.mxu2 %v3548_v35 }
  0xc5   : > { %2163 = vmatpush.bf16.msrb.mxu3 %v3556_v36 }
  0xc6   : > { %2192 = vmatpush.bf16.msrb.mxu0 %v3564_v53  ;;  %2221 = vmatpush.bf16.msrb.mxu1 %v3572_v54  ;;  %v2764_v54 = vor.u32 %v3458_v41, %v2763_v40  ;;  %v2635_v41 = vld [vmem:[%s4003_s8 + $0xb8] sm:$0xf] }
  0xc7   : > { %1922 = vmatmul.bf16.gmra.mxu2 %v2748_v27  ;;  %v3560_v27 = vld [vmem:[%s4010_s21 + $0x300] sm:$0xff] }
  0xc8   : > { %1951 = vmatmul.bf16.gmra.mxu3 %v2752_v28  ;;  %2135 = vmatpush.bf16.msrb.mxu2 %v3547_v51 }
  0xc9   : > { %1980 = vmatmul.bf16.gmra.mxu0 %v2756_v29  ;;  %2164 = vmatpush.bf16.msrb.mxu3 %v3555_v52 }
  0xca   : > { %2193 = vmatpush.bf16.msrb.mxu0 %v3563_v57  ;;  %2222 = vmatpush.bf16.msrb.mxu1 %v3571_v4 }
  0xcb   : > { %2009 = vmatmul.bf16.gmra.mxu1 %v2760_v30 }
  0xcc   : > { %2136 = vmatpush.bf16.msrb.mxu2 %v3546_v55  ;;  %v2768_v55 = vor.u32 %v3449_v45, %v2765_v46  ;;  %v3604_v45 = vld [vmem:[%s4010_s21 + $0x460] sm:$0xff]  ;;  %v3578_v46 = vld [vmem:[%s4010_s21 + $0x390] sm:$0xff] }
  0xcd   : > { %2165 = vmatpush.bf16.msrb.mxu3 %v3554_v56 }
  0xce   : > { %2194 = vmatpush.bf16.msrb.mxu0 %v3562_v9  ;;  %2223 = vmatpush.bf16.msrb.mxu1 %v3570_v10  ;;  %v3397_v9 = vld [vmem:[%s4003_s8 + $0x2c] sm:$0xf]  ;;  %v3606_v10 = vld [vmem:[%s4010_s21 + $0x470] sm:$0xff] }
  0xd0   : > { %2137 = vmatpush.bf16.msrb.mxu2 %v3545_v7  ;;  %v2563_v7 = vld [vmem:[%s4003_s8 + $0x28] sm:$0xf] }
  0xd1   : > { %2166 = vmatpush.bf16.msrb.mxu3 %v3553_v8  ;;  %v3406_v8 = vld [vmem:[%s4003_s8 + $0x6c] sm:$0xf0] }
  0xd2   : > { %2195 = vmatpush.bf16.msrb.mxu0 %v3561_v13  ;;  %2224 = vmatpush.bf16.msrb.mxu1 %v3569_v22  ;;  %v2565_v13 = vld [vmem:[%s4003_s8 + $0x70] sm:$0xf0]  ;;  %v2564_v22 = vor.u32 %v3406_v8, %v2563_v7  ;;  %v3585_v7 = vld [vmem:[%s4010_s21 + $0x3c8] sm:$0xff] }
  0xd4   : > { %2138 = vmatpush.bf16.msrb.mxu2 %v3544_v11  ;;  %v3580_v11 = vld [vmem:[%s4010_s21 + $0x3a0] sm:$0xff] }
  0xd5   : > { %2167 = vmatpush.bf16.msrb.mxu3 %v3552_v12  ;;  %v3588_v12 = vld [vmem:[%s4010_s21 + $0x3e0] sm:$0xff] }
  0xd6   : > { %2196 = vmatpush.bf16.msrb.mxu0 %v3560_v27  ;;  %2225 = vmatpush.bf16.msrb.mxu1 %v3568_v31  ;;  %v3587_v31 = vld [vmem:[%s4010_s21 + $0x3d8] sm:$0xff] }
  0xd7   : > { %2023 = vmatmul.bf16.vlgmr.msra.gmra.mxu2 %v2548_v47  ;;  %v2771_v47 = vld [vmem:[%s4003_s8 + $0x1d0] sm:$0xf] }
  0xd8   : > { %2052 = vmatmul.bf16.vlgmr.msra.gmra.mxu3 %v2552_v48  ;;  %2247 = vmatpush.bf16.msra.mxu2 %v3583_v32  ;;  %v3459_v48 = vld [vmem:[%s4003_s8 + $0x214] sm:$0xf0]  ;;  %v3596_v32 = vld [vmem:[%s4010_s21 + $0x420] sm:$0xff] }
  0xd9   : > { %2081 = vmatmul.bf16.vlgmr.msra.gmra.mxu0 %v2556_v49  ;;  %2276 = vmatpush.bf16.msra.mxu3 %v3591_v33  ;;  %v3450_v49 = vld [vmem:[%s4003_s8 + $0x1d4] sm:$0xf]  ;;  %v2772_v56 = vor.u32 %v3459_v48, %v2771_v47  ;;  %v2637_v48 = vld [vmem:[%s4003_s8 + $0x100] sm:$0xf0] }
  0xda   : > { %2305 = vmatpush.bf16.msra.mxu0 %v3599_v44  ;;  %v3586_v47 = vld [vmem:[%s4010_s21 + $0x3d0] sm:$0xff] }
  0xdb   : > { %2110 = vmatmul.bf16.vlgmr.msra.gmra.mxu1 %v2560_v50  ;;  %v2773_v50 = vld [vmem:[%s4003_s8 + $0x218] sm:$0xf0] }
  0xdc   : > { %2248 = vmatpush.bf16.msra.mxu2 %v3582_v42  ;;  %v2776_v57 = vor.u32 %v3450_v49, %v2773_v50  ;;  %2334 = vmatpush.bf16.msra.mxu1 %v3607_v61  ;;  %v3424_v42 = vld [vmem:[%s4003_s8 + $0xfc] sm:$0xf0]  ;;  %v3595_v50 = vld [vmem:[%s4010_s21 + $0x418] sm:$0xff] }
  0xdd   : > { %2277 = vmatpush.bf16.msra.mxu3 %v3590_v43  ;;  %v3415_v43 = vld [vmem:[%s4003_s8 + $0xbc] sm:$0xf]  ;;  %v2643_v49 = vld [vmem:[%s4003_s8 + $0xc0] sm:$0xf] }
  0xde   : > { %2306 = vmatpush.bf16.msra.mxu0 %v3598_v0 }
  0xe0   : > { %2249 = vmatpush.bf16.msra.mxu2 %v3581_v62  ;;  %2335 = vmatpush.bf16.msra.mxu1 %v3606_v10 }
  0xe1   : > { %2278 = vmatpush.bf16.msra.mxu3 %v3589_v63 }
  0xe2   : > { %2307 = vmatpush.bf16.msra.mxu0 %v3597_v15  ;;  %v2707_v15 = vld [vmem:[%s4003_s8 + $0x148] sm:$0xf] }
  0xe4   : > { %2250 = vmatpush.bf16.msra.mxu2 %v3580_v11 }
  0xe5   : > { %2279 = vmatpush.bf16.msra.mxu3 %v3588_v12 }
  0xe6   : > { %2308 = vmatpush.bf16.msra.mxu0 %v3596_v32  ;;  %v3601_v32 = vld [vmem:[%s4010_s21 + $0x448] sm:$0xff] }
  0xe7   : > { %2028 = vmatmul.bf16.gmra.mxu2 %v2620_v2 }
  0xe8   : > { %2057 = vmatmul.bf16.gmra.mxu3 %v2624_v3 }
  0xe9   : > { %2086 = vmatmul.bf16.gmra.mxu0 %v2628_v5  ;;  %2280 = vmatpush.bf16.msra.mxu3 %v3587_v31 }
  0xea   : > { %2309 = vmatpush.bf16.msra.mxu0 %v3595_v50 }
  0xeb   : > { %2115 = vmatmul.bf16.gmra.mxu1 %v2632_v6 }
  0xed   : > { %2281 = vmatpush.bf16.msra.mxu3 %v3586_v47 }
  0xf1   : > { %2282 = vmatpush.bf16.msra.mxu3 %v3585_v7 }
  0xf4   : > { %v1850_v28 = vpop.f32.mrf.mxu0 }
  0xf6   : > { %v1879_v29 = vpop.f32.mrf.mxu1 }
  0xf7   : > { %v4205_v30 = vadd.f32 %v1879_v29, %v1850_v28  ;;  %2033 = vmatmul.bf16.gmra.mxu2 %v2692_v23  ;;  %v2568_v23 = vor.u32 %v3397_v9, %v2565_v13  ;;  %v3605_v28 = vld [vmem:[%s4010_s21 + $0x468] sm:$0xff]  ;;  %v3579_v29 = vld [vmem:[%s4010_s21 + $0x398] sm:$0xff] }
  0xf8   : > { %2062 = vmatmul.bf16.gmra.mxu3 %v2696_v24  ;;  %v2572_v24 = vor.u32 %v3407_v16, %v2571_v14  ;;  %2336 = vmatpush.bf16.msra.mxu1 %v3605_v28  ;;  %v3442_v16 = vld [vmem:[%s4003_s8 + $0x18c] sm:$0xf0] }
  0xf9   : > { %2091 = vmatmul.bf16.gmra.mxu0 %v2700_v25  ;;  %v2576_v25 = vor.u32 %v3398_v17, %v2573_v18  ;;  %2251 = vmatpush.bf16.msra.mxu2 %v3579_v29  ;;  %v3602_v17 = vld [vmem:[%s4010_s21 + $0x450] sm:$0xff] }
  0xfa   : > { %v1860_v34 = vpop.f32.mrf.mxu2 }
  0xfb   : > { %2120 = vmatmul.bf16.gmra.mxu1 %v2704_v26  ;;  %v1889_v35 = vpop.f32.mrf.mxu3 }
  0xfc   : > { %v4210_v36 = vadd.f32 %v1889_v35, %v1860_v34  ;;  %v1852_v37 = vpop.f32.mrf.mxu0  ;;  %2337 = vmatpush.bf16.msra.mxu1 %v3604_v45 }
  0xfd   : > { %2252 = vmatpush.bf16.msra.mxu2 %v3578_v46 }
  0xfe   : > { %v1881_v38 = vpop.f32.mrf.mxu1 }
  0xff   : > { %v4212_v39 = vadd.f32 %v1881_v38, %v1852_v37 }
 0x102   : > { %v1862_v51 = vpop.f32.mrf.mxu2 }
 0x103   : > { %v1891_v52 = vpop.f32.mrf.mxu3 }
 0x104   : > { %v4225_v53 = vadd.f32 %v1891_v52, %v1862_v51  ;;  %v1855_v58 = vpop.f32.mrf.mxu0  ;;  %v3425_v51 = vld [vmem:[%s4003_s8 + $0x104] sm:$0xf0]  ;;  %v3416_v52 = vld [vmem:[%s4003_s8 + $0xc4] sm:$0xf] }
 0x105   : > { %v2644_v61 = vor.u32 %v3425_v51, %v2643_v49 }
 0x106   : > { %v1884_v59 = vpop.f32.mrf.mxu1 }
 0x107   : > { %v4227_v60 = vadd.f32 %v1884_v59, %v1855_v58  ;;  %2038 = vmatmul.bf16.gmra.mxu2 %v2764_v54  ;;  %v2645_v54 = vld [vmem:[%s4003_s8 + $0x108] sm:$0xf0]  ;;  %v2636_v58 = vor.u32 %v3424_v42, %v2635_v41  ;;  %v2640_v59 = vor.u32 %v3415_v43, %v2637_v48 }
 0x108   : > { %2067 = vmatmul.bf16.gmra.mxu3 %v2768_v55  ;;  %v2648_v62 = vor.u32 %v3416_v52, %v2645_v54  ;;  %v2779_v54 = vld [vmem:[%s4003_s8 + $0x1d8] sm:$0xf] }
 0x109   : > { %2096 = vmatmul.bf16.gmra.mxu0 %v2772_v56 }
 0x10a   : > { %v1865_v1 = vpop.f32.mrf.mxu2 }
 0x10b   : > { %2125 = vmatmul.bf16.gmra.mxu1 %v2776_v57  ;;  %v1894_v2 = vpop.f32.mrf.mxu3 }
 0x10c   : > { %v4233_v3 = vadd.f32 %v1894_v2, %v1865_v1  ;;  %v1857_v4 = vpop.f32.mrf.mxu0 }
 0x10e   : > { %v1886_v5 = vpop.f32.mrf.mxu1 }
 0x10f   : > { %v4235_v6 = vadd.f32 %v1886_v5, %v1857_v4  ;;  %v3603_v4 = vld [vmem:[%s4010_s21 + $0x458] sm:$0xff]  ;;  %v3577_v5 = vld [vmem:[%s4010_s21 + $0x388] sm:$0xff] }
 0x110   : > { %2338 = vmatpush.bf16.msra.mxu1 %v3603_v4  ;;  %2253 = vmatpush.bf16.msra.mxu2 %v3577_v5 }
 0x112   : > { %v1867_v19 = vpop.f32.mrf.mxu2 }
 0x113   : > { %v1896_v20 = vpop.f32.mrf.mxu3 }
 0x114   : > { %v4249_v21 = vadd.f32 %v1896_v20, %v1867_v19  ;;  %v3576_v19 = vld [vmem:[%s4010_s21 + $0x380] sm:$0xff]  ;;  %2339 = vmatpush.bf16.msra.mxu1 %v3602_v17 }
 0x115   : > { %v3584_v20 = vld [vmem:[%s4010_s21 + $0x3c0] sm:$0xff]  ;;  %2254 = vmatpush.bf16.msra.mxu2 %v3576_v19  ;;  %v2579_v19 = vld [vmem:[%s4003_s8 + $0x38] sm:$0xf] }
 0x116   : > { %v1966_v26 = vpop.f32.mrf.mxu0  ;;  %2283 = vmatpush.bf16.msra.mxu3 %v3584_v20  ;;  %v3408_v20 = vld [vmem:[%s4003_s8 + $0x7c] sm:$0xf0] }
 0x117   : > { %2139 = vmatmul.bf16.vlgmr.msrb.gmra.mxu2 %v2564_v22  ;;  %v3593_v22 = vld [vmem:[%s4010_s21 + $0x408] sm:$0xff] }
 0x118   : > { %v1995_v27 = vpop.f32.mrf.mxu1  ;;  %2168 = vmatmul.bf16.vlgmr.msrb.gmra.mxu3 %v2568_v23  ;;  %v3433_v23 = vld [vmem:[%s4003_s8 + $0x14c] sm:$0xf]  ;;  %2340 = vmatpush.bf16.msra.mxu1 %v3601_v32 }
 0x119   : > { %2197 = vmatmul.bf16.vlgmr.msrb.gmra.mxu0 %v2572_v24  ;;  %v2709_v24 = vld [vmem:[%s4003_s8 + $0x190] sm:$0xf0] }
 0x11a   : > { %v1908_v33 = vpop.f32.mrf.mxu2 }
 0x11b   : > { %2226 = vmatmul.bf16.vlgmr.msrb.gmra.mxu1 %v2576_v25  ;;  %v1937_v34 = vpop.f32.mrf.mxu3  ;;  %v1909_v35 = vadd.f32 %v1908_v33, %v4205_v30  ;;  %v2715_v25 = vld [vmem:[%s4003_s8 + $0x150] sm:$0xf] }
 0x11d   : > { %v1938_v37 = vadd.f32 %v1937_v34, %v1909_v35  ;;  %v2708_v34 = vor.u32 %v3442_v16, %v2707_v15  ;;  %v2712_v35 = vor.u32 %v3433_v23, %v2709_v24  ;;  %v2581_v23 = vld [vmem:[%s4003_s8 + $0x80] sm:$0xf0]  ;;  %v2587_v24 = vld [vmem:[%s4003_s8 + $0x40] sm:$0xf] }
 0x11e   : > { %v1968_v38 = vpop.f32.mrf.mxu0 }
 0x11f   : > { %v1967_v44 = vadd.f32 %v1966_v26, %v1938_v37  ;;  %v3443_v26 = vld [vmem:[%s4003_s8 + $0x194] sm:$0xf0] }
 0x120   : > { %v1997_v40 = vpop.f32.mrf.mxu1  ;;  %v2716_v37 = vor.u32 %v3443_v26, %v2715_v25  ;;  %v3409_v25 = vld [vmem:[%s4003_s8 + $0x84] sm:$0xf0]  ;;  %v3400_v26 = vld [vmem:[%s4003_s8 + $0x44] sm:$0xf] }
 0x121   : > { %v4268_v30 = vadd.f32 %v1995_v27, %v1967_v44  ;;  %v2717_v27 = vld [vmem:[%s4003_s8 + $0x198] sm:$0xf0]  ;;  %v3600_v44 = vld [vmem:[%s4010_s21 + $0x440] sm:$0xff] }
 0x122   : > { %v1910_v55 = vpop.f32.mrf.mxu2  ;;  %2341 = vmatpush.bf16.msra.mxu1 %v3600_v44 }
 0x123   : > { %v1939_v56 = vpop.f32.mrf.mxu3  ;;  %v1911_v57 = vadd.f32 %v1910_v55, %v4212_v39  ;;  %v3594_v39 = vld [vmem:[%s4010_s21 + $0x410] sm:$0xff]  ;;  %v3460_v55 = vld [vmem:[%s4003_s8 + $0x21c] sm:$0xf0] }
 0x124   : > { %2310 = vmatpush.bf16.msra.mxu0 %v3594_v39  ;;  %v2780_v4 = vor.u32 %v3460_v55, %v2779_v54  ;;  %v2659_v54 = vld [vmem:[%s4003_s8 + $0xd0] sm:$0xf]  ;;  %v3427_v55 = vld [vmem:[%s4003_s8 + $0x114] sm:$0xf0] }
 0x125   : > { %v1940_v63 = vadd.f32 %v1939_v56, %v1911_v57  ;;  %v3451_v56 = vld [vmem:[%s4003_s8 + $0x1dc] sm:$0xf]  ;;  %v2781_v57 = vld [vmem:[%s4003_s8 + $0x220] sm:$0xf0] }
 0x126   : > { %v1971_v0 = vpop.f32.mrf.mxu0 }
 0x127   : > { %v1969_v2 = vadd.f32 %v1968_v38, %v1940_v63  ;;  %2144 = vmatmul.bf16.gmra.mxu2 %v2636_v58  ;;  %v2787_v58 = vld [vmem:[%s4003_s8 + $0x1e0] sm:$0xf] }
 0x128   : > { %v2000_v1 = vpop.f32.mrf.mxu1  ;;  %2173 = vmatmul.bf16.gmra.mxu3 %v2640_v59  ;;  %2311 = vmatpush.bf16.msra.mxu0 %v3593_v22  ;;  %v3461_v59 = vld [vmem:[%s4003_s8 + $0x224] sm:$0xf0]  ;;  %v3399_v22 = vld [vmem:[%s4003_s8 + $0x3c] sm:$0xf] }
 0x129   : > { %2202 = vmatmul.bf16.gmra.mxu0 %v2644_v61  ;;  %v4275_v8 = vadd.f32 %v1997_v40, %v1969_v2  ;;  %v3592_v40 = vld [vmem:[%s4010_s21 + $0x400] sm:$0xff]  ;;  %v2788_v5 = vor.u32 %v3461_v59, %v2787_v58 }
 0x12a   : > { %v1913_v9 = vpop.f32.mrf.mxu2  ;;  %v3452_v61 = vld [vmem:[%s4003_s8 + $0x1e4] sm:$0xf] }
 0x12b   : > { %2231 = vmatmul.bf16.gmra.mxu1 %v2648_v62  ;;  %v1942_v10 = vpop.f32.mrf.mxu3  ;;  %v1914_v11 = vadd.f32 %v1913_v9, %v4227_v60  ;;  %v3434_v60 = vld [vmem:[%s4003_s8 + $0x154] sm:$0xf]  ;;  %v2789_v62 = vld [vmem:[%s4003_s8 + $0x228] sm:$0xf0] }
 0x12c   : > { %v2720_v38 = vor.u32 %v3434_v60, %v2717_v27  ;;  %2312 = vmatpush.bf16.msra.mxu0 %v3592_v40  ;;  %v2792_v7 = vor.u32 %v3452_v61, %v2789_v62  ;;  %v2589_v60 = vld [vmem:[%s4003_s8 + $0x88] sm:$0xf0] }
 0x12d   : > { %v1943_v12 = vadd.f32 %v1942_v10, %v1914_v11 }
 0x12e   : > { %v1973_v13 = vpop.f32.mrf.mxu0 }
 0x12f   : > { %v1972_v18 = vadd.f32 %v1971_v0, %v1943_v12 }
 0x130   : > { %v2002_v14 = vpop.f32.mrf.mxu1 }
 0x131   : > { %v4290_v28 = vadd.f32 %v2000_v1, %v1972_v18 }
 0x132   : > { %v1915_v29 = vpop.f32.mrf.mxu2 }
 0x133   : > { %v1944_v31 = vpop.f32.mrf.mxu3  ;;  %v1916_v33 = vadd.f32 %v1915_v29, %v4235_v6 }
 0x135   : > { %v1945_v41 = vadd.f32 %v1944_v31, %v1916_v33  ;;  %v2580_v33 = vor.u32 %v3408_v20, %v2579_v19  ;;  %v2731_v19 = vld [vmem:[%s4003_s8 + $0x160] sm:$0xf]  ;;  %v3445_v20 = vld [vmem:[%s4003_s8 + $0x1a4] sm:$0xf0] }
 0x136   : > { %v1976_v42 = vpop.f32.mrf.mxu0 }
 0x137   : > { %v1974_v45 = vadd.f32 %v1973_v13, %v1945_v41  ;;  %2149 = vmatmul.bf16.gmra.mxu2 %v2708_v34  ;;  %v2588_v34 = vor.u32 %v3409_v25, %v2587_v24 }
 0x138   : > { %v2005_v43 = vpop.f32.mrf.mxu1  ;;  %2178 = vmatmul.bf16.gmra.mxu3 %v2712_v35  ;;  %v2592_v35 = vor.u32 %v3400_v26, %v2589_v60 }
 0x139   : > { %2207 = vmatmul.bf16.gmra.mxu0 %v2716_v37  ;;  %v4296_v6 = vadd.f32 %v2002_v14, %v1974_v45 }
 0x13a   : > { %v1918_v46 = vpop.f32.mrf.mxu2 }
 0x13b   : > { %2236 = vmatmul.bf16.gmra.mxu1 %v2720_v38  ;;  %v1947_v47 = vpop.f32.mrf.mxu3  ;;  %v1919_v48 = vadd.f32 %v1918_v46, %v4210_v36  ;;  %v2784_v36 = vor.u32 %v3451_v56, %v2781_v57  ;;  %v3418_v56 = vld [vmem:[%s4003_s8 + $0xd4] sm:$0xf]  ;;  %v2661_v57 = vld [vmem:[%s4003_s8 + $0x118] sm:$0xf0] }
 0x13d   : > { %v1948_v49 = vadd.f32 %v1947_v47, %v1919_v48 }
 0x13e   : > { %v1978_v50 = vpop.f32.mrf.mxu0 }
 0x13f   : > { %v1977_v52 = vadd.f32 %v1976_v42, %v1948_v49  ;;  %v2651_v49 = vld [vmem:[%s4003_s8 + $0xc8] sm:$0xf] }
 0x140   : > { %v2007_v51 = vpop.f32.mrf.mxu1 }
 0x141   : > { %v4307_v63 = vadd.f32 %v2005_v43, %v1977_v52  ;;  %v2653_v52 = vld [vmem:[%s4003_s8 + $0x110] sm:$0xf0] }
 0x142   : > { %v1920_v0 = vpop.f32.mrf.mxu2 }
 0x143   : > { %v1949_v1 = vpop.f32.mrf.mxu3  ;;  %v1921_v2 = vadd.f32 %v1920_v0, %v4225_v53 }
 0x145   : > { %v1950_v39 = vadd.f32 %v1949_v1, %v1921_v2  ;;  %v2660_v1 = vor.u32 %v3427_v55, %v2659_v54  ;;  %v2664_v2 = vor.u32 %v3418_v56, %v2661_v57 }
 0x146   : > { %v1981_v9 = vpop.f32.mrf.mxu0 }
 0x147   : > { %v1979_v11 = vadd.f32 %v1978_v50, %v1950_v39  ;;  %2154 = vmatmul.bf16.gmra.mxu2 %v2780_v4  ;;  %v3426_v50 = vld [vmem:[%s4003_s8 + $0x10c] sm:$0xf0] }
 0x148   : > { %v2010_v10 = vpop.f32.mrf.mxu1  ;;  %2183 = vmatmul.bf16.gmra.mxu3 %v2784_v36  ;;  %v2652_v0 = vor.u32 %v3426_v50, %v2651_v49  ;;  %v2803_v49 = vld [vmem:[%s4003_s8 + $0x1f0] sm:$0xf]  ;;  %v3463_v50 = vld [vmem:[%s4003_s8 + $0x234] sm:$0xf0] }
 0x149   : > { %2212 = vmatmul.bf16.gmra.mxu0 %v2788_v5  ;;  %v4310_v53 = vadd.f32 %v2007_v51, %v1979_v11  ;;  %v3417_v51 = vld [vmem:[%s4003_s8 + $0xcc] sm:$0xf] }
 0x14a   : > { %v1923_v12 = vpop.f32.mrf.mxu2 }
 0x14b   : > { %2241 = vmatmul.bf16.gmra.mxu1 %v2792_v7  ;;  %v1952_v13 = vpop.f32.mrf.mxu3  ;;  %v1924_v14 = vadd.f32 %v1923_v12, %v4233_v3  ;;  %v2584_v3 = vor.u32 %v3399_v22, %v2581_v23  ;;  %v3436_v22 = vld [vmem:[%s4003_s8 + $0x164] sm:$0xf]  ;;  %v2733_v23 = vld [vmem:[%s4003_s8 + $0x1a8] sm:$0xf0] }
 0x14d   : > { %v1953_v15 = vadd.f32 %v1952_v13, %v1924_v14 }
 0x14e   : > { %v1983_v16 = vpop.f32.mrf.mxu0 }
 0x14f   : > { %v1982_v18 = vadd.f32 %v1981_v9, %v1953_v15  ;;  %v2723_v15 = vld [vmem:[%s4003_s8 + $0x158] sm:$0xf] }
 0x150   : > { %v2012_v17 = vpop.f32.mrf.mxu1 }
 0x151   : > { %v4321_v27 = vadd.f32 %v2010_v10, %v1982_v18  ;;  %v2725_v18 = vld [vmem:[%s4003_s8 + $0x1a0] sm:$0xf0] }
 0x152   : > { %v1925_v29 = vpop.f32.mrf.mxu2 }
 0x153   : > { %v1954_v31 = vpop.f32.mrf.mxu3  ;;  %v1926_v32 = vadd.f32 %v1925_v29, %v4249_v21 }
 0x155   : > { %v1955_v37 = vadd.f32 %v1954_v31, %v1926_v32  ;;  %v2732_v31 = vor.u32 %v3445_v20, %v2731_v19  ;;  %v2736_v32 = vor.u32 %v3436_v22, %v2733_v23 }
 0x156   : > { %v2082_v38 = vpop.f32.mrf.mxu0 }
 0x157   : > { %v1984_v41 = vadd.f32 %v1983_v16, %v1955_v37  ;;  %2255 = vmatmul.bf16.vlgmr.msra.gmra.mxu2 %v2580_v33  ;;  %v3444_v16 = vld [vmem:[%s4003_s8 + $0x19c] sm:$0xf0] }
 0x158   : > { %v2111_v40 = vpop.f32.mrf.mxu1  ;;  %2284 = vmatmul.bf16.vlgmr.msra.gmra.mxu3 %v2584_v3  ;;  %v2724_v29 = vor.u32 %v3444_v16, %v2723_v15 }
 0x159   : > { %2313 = vmatmul.bf16.vlgmr.msra.gmra.mxu0 %v2588_v34  ;;  %v4324_v21 = vadd.f32 %v2012_v17, %v1984_v41  ;;  %v3435_v17 = vld [vmem:[%s4003_s8 + $0x15c] sm:$0xf] }
 0x15a   : > { %v2024_v42 = vpop.f32.mrf.mxu2 }
 0x15b   : > { %2342 = vmatmul.bf16.vlgmr.msra.gmra.mxu1 %v2592_v35  ;;  %v2053_v43 = vpop.f32.mrf.mxu3  ;;  %v2025_v44 = vadd.f32 %v2024_v42, %v4268_v30  ;;  %v2656_v30 = vor.u32 %v3417_v51, %v2653_v52  ;;  %v3454_v51 = vld [vmem:[%s4003_s8 + $0x1f4] sm:$0xf]  ;;  %v2805_v52 = vld [vmem:[%s4003_s8 + $0x238] sm:$0xf0] }
 0x15d   : > { %v2054_v45 = vadd.f32 %v2053_v43, %v2025_v44 }
 0x15e   : > { %v2084_v46 = vpop.f32.mrf.mxu0 }
 0x15f   : > { %v2083_v48 = vadd.f32 %v2082_v38, %v2054_v45  ;;  %v2795_v45 = vld [vmem:[%s4003_s8 + $0x1e8] sm:$0xf] }
 0x160   : > { %v2113_v47 = vpop.f32.mrf.mxu1 }
 0x161   : > { %v4335_v58 = vadd.f32 %v2111_v40, %v2083_v48  ;;  %v2797_v48 = vld [vmem:[%s4003_s8 + $0x230] sm:$0xf0] }
 0x162   : > { %v2026_v59 = vpop.f32.mrf.mxu2 }
 0x163   : > { %v2055_v61 = vpop.f32.mrf.mxu3  ;;  %v2027_v62 = vadd.f32 %v2026_v59, %v4275_v8 }
 0x165   : > { %v2056_v4 = vadd.f32 %v2055_v61, %v2027_v62  ;;  %v2804_v61 = vor.u32 %v3463_v50, %v2803_v49  ;;  %v2808_v62 = vor.u32 %v3454_v51, %v2805_v52 }
 0x166   : > { %v2087_v36 = vpop.f32.mrf.mxu0 }
 0x167   : > { %v2085_v7 = vadd.f32 %v2084_v46, %v2056_v4  ;;  %2260 = vmatmul.bf16.gmra.mxu2 %v2652_v0  ;;  %v3462_v46 = vld [vmem:[%s4003_s8 + $0x22c] sm:$0xf0] }
 0x168   : > { %v2116_v5 = vpop.f32.mrf.mxu1  ;;  %2289 = vmatmul.bf16.gmra.mxu3 %v2656_v30  ;;  %v2796_v59 = vor.u32 %v3462_v46, %v2795_v45 }
 0x169   : > { %2318 = vmatmul.bf16.gmra.mxu0 %v2660_v1  ;;  %v4338_v8 = vadd.f32 %v2113_v47, %v2085_v7  ;;  %v3453_v47 = vld [vmem:[%s4003_s8 + $0x1ec] sm:$0xf] }
 0x16a   : > { %v2029_v39 = vpop.f32.mrf.mxu2 }
 0x16b   : > { %2347 = vmatmul.bf16.gmra.mxu1 %v2664_v2  ;;  %v2058_v9 = vpop.f32.mrf.mxu3  ;;  %v2030_v10 = vadd.f32 %v2029_v39, %v4290_v28  ;;  %v2728_v28 = vor.u32 %v3435_v17, %v2725_v18 }
 0x16d   : > { %v2059_v11 = vadd.f32 %v2058_v9, %v2030_v10 }
 0x16e   : > { %v2089_v12 = vpop.f32.mrf.mxu0 }
 0x16f   : > { %v2088_v14 = vadd.f32 %v2087_v36, %v2059_v11 }
 0x170   : > { %v2118_v13 = vpop.f32.mrf.mxu1 }
 0x171   : > { %v4349_v24 = vadd.f32 %v2116_v5, %v2088_v14 }
 0x172   : > { %v2031_v25 = vpop.f32.mrf.mxu2 }
 0x173   : > { %v2060_v26 = vpop.f32.mrf.mxu3  ;;  %v2032_v60 = vadd.f32 %v2031_v25, %v4296_v6 }
 0x175   : > { %v2061_v33 = vadd.f32 %v2060_v26, %v2032_v60 }
 0x176   : > { %v2092_v3 = vpop.f32.mrf.mxu0 }
 0x177   : > { %v2090_v35 = vadd.f32 %v2089_v12, %v2061_v33  ;;  %2265 = vmatmul.bf16.gmra.mxu2 %v2724_v29 }
 0x178   : > { %v2121_v34 = vpop.f32.mrf.mxu1  ;;  %2294 = vmatmul.bf16.gmra.mxu3 %v2728_v28 }
 0x179   : > { %2323 = vmatmul.bf16.gmra.mxu0 %v2732_v31  ;;  %v4352_v6 = vadd.f32 %v2118_v13, %v2090_v35 }
 0x17a   : > { %v2034_v37 = vpop.f32.mrf.mxu2 }
 0x17b   : > { %2352 = vmatmul.bf16.gmra.mxu1 %v2736_v32  ;;  %v2063_v38 = vpop.f32.mrf.mxu3  ;;  %v2035_v40 = vadd.f32 %v2034_v37, %v4307_v63  ;;  %v2800_v63 = vor.u32 %v3453_v47, %v2797_v48 }
 0x17d   : > { %v2064_v41 = vadd.f32 %v2063_v38, %v2035_v40 }
 0x17e   : > { %v2094_v42 = vpop.f32.mrf.mxu0 }
 0x17f   : > { %v2093_v44 = vadd.f32 %v2092_v3, %v2064_v41 }
 0x180   : > { %v2123_v43 = vpop.f32.mrf.mxu1 }
 0x181   : > { %v4363_v54 = vadd.f32 %v2121_v34, %v2093_v44 }
 0x182   : > { %v2036_v55 = vpop.f32.mrf.mxu2 }
 0x183   : > { %v2065_v56 = vpop.f32.mrf.mxu3  ;;  %v2037_v57 = vadd.f32 %v2036_v55, %v4310_v53 }
 0x185   : > { %v2066_v0 = vadd.f32 %v2065_v56, %v2037_v57 }
 0x186   : > { %v2097_v30 = vpop.f32.mrf.mxu0 }
 0x187   : > { %v2095_v2 = vadd.f32 %v2094_v42, %v2066_v0  ;;  %2270 = vmatmul.bf16.gmra.mxu2 %v2796_v59 }
 0x188   : > { %v2126_v1 = vpop.f32.mrf.mxu1  ;;  %2299 = vmatmul.bf16.gmra.mxu3 %v2800_v63 }
 0x189   : > { %2328 = vmatmul.bf16.gmra.mxu0 %v2804_v61  ;;  %v4366_v4 = vadd.f32 %v2123_v43, %v2095_v2 }
 0x18a   : > { %v2039_v36 = vpop.f32.mrf.mxu2 }
 0x18b   : > { %2357 = vmatmul.bf16.gmra.mxu1 %v2808_v62  ;;  %v2068_v5 = vpop.f32.mrf.mxu3  ;;  %v2040_v7 = vadd.f32 %v2039_v36, %v4321_v27 }
 0x18d   : > { %v2069_v39 = vadd.f32 %v2068_v5, %v2040_v7 }
 0x18e   : > { %v2099_v53 = vpop.f32.mrf.mxu0 }
 0x18f   : > { %v2098_v10 = vadd.f32 %v2097_v30, %v2069_v39 }
 0x190   : > { %v2128_v9 = vpop.f32.mrf.mxu1 }
 0x191   : > { %v4369_v11 = vadd.f32 %v2126_v1, %v2098_v10 }
 0x192   : > { %v2041_v12 = vpop.f32.mrf.mxu2 }
 0x193   : > { %v2070_v13 = vpop.f32.mrf.mxu3  ;;  %v2042_v14 = vadd.f32 %v2041_v12, %v4324_v21 }
 0x195   : > { %v2071_v15 = vadd.f32 %v2070_v13, %v2042_v14 }
 0x196   : > { %v2198_v16 = vpop.f32.mrf.mxu0 }
 0x197   : > { %v2100_v18 = vadd.f32 %v2099_v53, %v2071_v15  ;;  %v249_v53 = vld [vmem:[#allocation8] sm:$0xff] }
 0x198   : > { %v2227_v17 = vpop.f32.mrf.mxu1 }
 0x199   : > { %v4372_v19 = vadd.f32 %v2128_v9, %v2100_v18 }
 0x19a   : > { %v2140_v20 = vpop.f32.mrf.mxu2 }
 0x19b   : > { %v2169_v22 = vpop.f32.mrf.mxu3  ;;  %v2141_v48 = vadd.f32 %v2140_v20, %v4335_v58 }
 0x19d   : > { %v2170_v51 = vadd.f32 %v2169_v22, %v2141_v48 }
 0x19e   : > { %v2200_v23 = vpop.f32.mrf.mxu0 }
 0x19f   : > { %v2199_v56 = vadd.f32 %v2198_v16, %v2170_v51 }
 0x1a0   : > { %v2229_v27 = vpop.f32.mrf.mxu1 }
 0x1a1   : > { %v2228_v62 = vadd.f32 %v2227_v17, %v2199_v56 }
 0x1a2   : > { %v2142_v25 = vpop.f32.mrf.mxu2 }
 0x1a3   : > { %v2171_v26 = vpop.f32.mrf.mxu3  ;;  %v2143_v57 = vadd.f32 %v2142_v25, %v4338_v8 }
 0x1a5   : > { %v2172_v61 = vadd.f32 %v2171_v26, %v2143_v57 }
 0x1a6   : > { %v2203_v60 = vpop.f32.mrf.mxu0 }
 0x1a7   : > { %v2201_v58 = vadd.f32 %v2200_v23, %v2172_v61  ;;  %v250_v23 = vld [vmem:[#allocation8 + $0x8] sm:$0xff] }
 0x1a8   : > { %v2232_v29 = vpop.f32.mrf.mxu1 }
 0x1a9   : > { %v2230_v12 = vadd.f32 %v2229_v27, %v2201_v58 }
 0x1aa   : > { %v2145_v28 = vpop.f32.mrf.mxu2 }
 0x1ab   : > { %v2174_v31 = vpop.f32.mrf.mxu3  ;;  %v2146_v2 = vadd.f32 %v2145_v28, %v4349_v24 }
 0x1ad   : > { %v2175_v9 = vadd.f32 %v2174_v31, %v2146_v2 }
 0x1ae   : > { %v2205_v32 = vpop.f32.mrf.mxu0 }
 0x1af   : > { %v2204_v16 = vadd.f32 %v2203_v60, %v2175_v9 }
 0x1b0   : > { %v4374_v33 = vpop.f32.mrf.mxu1 }
 0x1b1   : > { %v2233_v28 = vadd.f32 %v2232_v29, %v2204_v16 }
 0x1b2   : > { %v2147_v21 = vpop.f32.mrf.mxu2 }
 0x1b3   : > { %v2176_v3 = vpop.f32.mrf.mxu3  ;;  %v2148_v17 = vadd.f32 %v2147_v21, %v4352_v6 }
 0x1b5   : > { %v2177_v25 = vadd.f32 %v2176_v3, %v2148_v17 }
 0x1b6   : > { %v4376_v34 = vpop.f32.mrf.mxu0 }
 0x1b7   : > { %v2206_v56 = vadd.f32 %v2205_v32, %v2177_v25 }
 0x1b8   : > { %v4378_v35 = vpop.f32.mrf.mxu1 }
 0x1ba   : > { %v2150_v37 = vpop.f32.mrf.mxu2 }
 0x1bb   : > { %v2179_v38 = vpop.f32.mrf.mxu3  ;;  %v2151_v57 = vadd.f32 %v2150_v37, %v4363_v54 }
 0x1bd   : > { %v2180_v61 = vadd.f32 %v2179_v38, %v2151_v57 }
 0x1be   : > { %v4380_v40 = vpop.f32.mrf.mxu0 }
 0x1bf   : > { %v2209_v58 = vadd.f32 %v4376_v34, %v2180_v61 }
 0x1c0   : > { %v4382_v41 = vpop.f32.mrf.mxu1 }
 0x1c2   : > { %v4384_v42 = vpop.f32.mrf.mxu2 }
 0x1c3   : > { %v4386_v43 = vpop.f32.mrf.mxu3  ;;  %v2153_v32 = vadd.f32 %v4384_v42, %v4366_v4 }
 0x1c6   : > { %v4388_v44 = vpop.f32.mrf.mxu0 }
 0x1c8   : > { %v4390_v45 = vpop.f32.mrf.mxu1 }
 0x1ca   : > { %v4392_v46 = vpop.f32.mrf.mxu2 }
 0x1cb   : > { %v4394_v47 = vpop.f32.mrf.mxu3  ;;  %v2156_v4 = vadd.f32 %v4392_v46, %v4369_v11 }
 0x1ce   : > { %v4397_v49 = vpop.f32.mrf.mxu0 }
 0x1d0   : > { %v4399_v50 = vpop.f32.mrf.mxu1 }
 0x1d2   : > { %v4401_v52 = vpop.f32.mrf.mxu2 }
 0x1d3   : > { %v4403_v55 = vpop.f32.mrf.mxu3  ;;  %v2158_v11 = vadd.f32 %v4401_v52, %v4372_v19  ;;  %v255_v52 = vld [vmem:[#allocation8 + $0x30] sm:$0xff] }
 0x1d6   : > { %v2314_v59 = vpop.f32.mrf.mxu0 }
 0x1d8   : > { %v2343_v63 = vpop.f32.mrf.mxu1 }
 0x1da   : > { %v2256_v0 = vpop.f32.mrf.mxu2 }
 0x1db   : > { %v2285_v30 = vpop.f32.mrf.mxu3  ;;  %v2257_v1 = vadd.f32 %v2256_v0, %v2228_v62  ;;  %v2235_v0 = vadd.f32 %v4374_v33, %v2206_v56  ;;  %v2238_v33 = vadd.f32 %v4378_v35, %v2209_v58 }
 0x1dd   : > { %v2286_v36 = vadd.f32 %v2285_v30, %v2257_v1 }
 0x1de   : > { %v2316_v5 = vpop.f32.mrf.mxu0 }
 0x1df   : > { %v2315_v39 = vadd.f32 %v2314_v59, %v2286_v36  ;;  %v252_v36 = vld [vmem:[#allocation8 + $0x18] sm:$0xff] }
 0x1e0   : > { %v2345_v7 = vpop.f32.mrf.mxu1 }
 0x1e1   : > { %v2344_v10 = vadd.f32 %v2343_v63, %v2315_v39  ;;  %v251_v63 = vld [vmem:[#allocation8 + $0x10] sm:$0xff] }
 0x1e2   : > { %v2258_v13 = vpop.f32.mrf.mxu2 }
 0x1e3   : > { %v2287_v8 = vpop.f32.mrf.mxu3  ;;  %v2363_v14 = vadd.f32 %v2344_v10, %v249_v53  ;;  %v2259_v15 = vadd.f32 %v2258_v13, %v2230_v12  ;;  %v253_v13 = vld [vmem:[#allocation8 + $0x20] sm:$0xff] }
 0x1e5   : > { %2371 = vst [vmem:[#allocation8] sm:$0xff] %v2363_v14  ;;  %v2288_v18 = vadd.f32 %v2287_v8, %v2259_v15  ;;  %v2185_v8 = vadd.f32 %v4394_v47, %v2156_v4  ;;  %v2187_v47 = vadd.f32 %v4403_v55, %v2158_v11 }
 0x1e6   : > { %v2319_v20 = vpop.f32.mrf.mxu0 }
 0x1e7   : > { %v2317_v24 = vadd.f32 %v2316_v5, %v2288_v18  ;;  %v2182_v5 = vadd.f32 %v4386_v43, %v2153_v32 }
 0x1e8   : > { %v2348_v22 = vpop.f32.mrf.mxu1 }
 0x1e9   : > { %v2346_v26 = vadd.f32 %v2345_v7, %v2317_v24  ;;  %v2211_v34 = vadd.f32 %v4380_v40, %v2182_v5  ;;  %v2214_v40 = vadd.f32 %v4388_v44, %v2185_v8  ;;  %v254_v24 = vld [vmem:[#allocation8 + $0x28] sm:$0xff] }
 0x1ea   : > { %v2261_v48 = vpop.f32.mrf.mxu2 }
 0x1eb   : > { %v2290_v31 = vpop.f32.mrf.mxu3  ;;  %v2364_v51 = vadd.f32 %v2346_v26, %v250_v23  ;;  %v2262_v27 = vadd.f32 %v2261_v48, %v2233_v28  ;;  %v2240_v15 = vadd.f32 %v4382_v41, %v2211_v34  ;;  %v2243_v25 = vadd.f32 %v4390_v45, %v2214_v40 }
 0x1ed   : > { %2372 = vst [vmem:[#allocation8 + $0x8] sm:$0xff] %v2364_v51  ;;  %v2291_v60 = vadd.f32 %v2290_v31, %v2262_v27  ;;  %v2216_v51 = vadd.f32 %v4397_v49, %v2187_v47 }
 0x1ee   : > { %v2321_v59 = vpop.f32.mrf.mxu0 }
 0x1ef   : > { %v2320_v6 = vadd.f32 %v2319_v20, %v2291_v60  ;;  %v2245_v57 = vadd.f32 %v4399_v50, %v2216_v51 }
 0x1f0   : > { %v2350_v21 = vpop.f32.mrf.mxu1 }
 0x1f1   : > { %v2349_v62 = vadd.f32 %v2348_v22, %v2320_v6 }
 0x1f2   : > { %v2263_v3 = vpop.f32.mrf.mxu2 }
 0x1f3   : > { %v2292_v30 = vpop.f32.mrf.mxu3  ;;  %v2365_v29 = vadd.f32 %v2349_v62, %v251_v63  ;;  %v2264_v1 = vadd.f32 %v2263_v3, %v2235_v0  ;;  %v256_v62 = vld [vmem:[#allocation8 + $0x38] sm:$0xff] }
 0x1f5   : > { %2373 = vst [vmem:[#allocation8 + $0x10] sm:$0xff] %v2365_v29  ;;  %v2293_v54 = vadd.f32 %v2292_v30, %v2264_v1 }
 0x1f6   : > { %v2324_v2 = vpop.f32.mrf.mxu0 }
 0x1f7   : > { %v2322_v37 = vadd.f32 %v2321_v59, %v2293_v54 }
 0x1f8   : > { %v2353_v7 = vpop.f32.mrf.mxu1 }
 0x1f9   : > { %v2351_v38 = vadd.f32 %v2350_v21, %v2322_v37 }
 0x1fa   : > { %v2266_v39 = vpop.f32.mrf.mxu2 }
 0x1fb   : > { %v2295_v53 = vpop.f32.mrf.mxu3  ;;  %v2366_v9 = vadd.f32 %v2351_v38, %v252_v36  ;;  %v2267_v10 = vadd.f32 %v2266_v39, %v2238_v33 }
 0x1fd   : > { %2374 = vst [vmem:[#allocation8 + $0x18] sm:$0xff] %v2366_v9  ;;  %v2296_v42 = vadd.f32 %v2295_v53, %v2267_v10 }
 0x1fe   : > { %v2326_v14 = vpop.f32.mrf.mxu0 }
 0x1ff   : > { %v2325_v12 = vadd.f32 %v2324_v2, %v2296_v42 }
 0x200   : > { %v2355_v20 = vpop.f32.mrf.mxu1 }
 0x201   : > { %v2354_v43 = vadd.f32 %v2353_v7, %v2325_v12 }
 0x202   : > { %v2268_v35 = vpop.f32.mrf.mxu2 }
 0x203   : > { %v2297_v16 = vpop.f32.mrf.mxu3  ;;  %v2367_v17 = vadd.f32 %v2354_v43, %v253_v13  ;;  %v2269_v18 = vadd.f32 %v2268_v35, %v2240_v15 }
 0x205   : > { %2375 = vst [vmem:[#allocation8 + $0x20] sm:$0xff] %v2367_v17  ;;  %v2298_v46 = vadd.f32 %v2297_v16, %v2269_v18 }
 0x206   : > { %v2329_v31 = vpop.f32.mrf.mxu0 }
 0x207   : > { %v2327_v22 = vadd.f32 %v2326_v14, %v2298_v46 }
 0x208   : > { %v2358_v27 = vpop.f32.mrf.mxu1 }
 0x209   : > { %v2356_v23 = vadd.f32 %v2355_v20, %v2327_v22 }
 0x20a   : > { %v2271_v41 = vpop.f32.mrf.mxu2 }
 0x20b   : > { %v2300_v26 = vpop.f32.mrf.mxu3  ;;  %v2368_v28 = vadd.f32 %v2356_v23, %v254_v24  ;;  %v2272_v48 = vadd.f32 %v2271_v41, %v2243_v25 }
 0x20d   : > { %2376 = vst [vmem:[#allocation8 + $0x28] sm:$0xff] %v2368_v28  ;;  %v2301_v44 = vadd.f32 %v2300_v26, %v2272_v48 }
 0x20e   : > { %v2331_v21 = vpop.f32.mrf.mxu0 }
 0x20f   : > { %v2330_v19 = vadd.f32 %v2329_v31, %v2301_v44 }
 0x210   : > { %v2360_v61 = vpop.f32.mrf.mxu1 }
 0x211   : > { %v2359_v56 = vadd.f32 %v2358_v27, %v2330_v19 }
 0x212   : > { %v2273_v60 = vpop.f32.mrf.mxu2 }
 0x213   : > { %v2369_v55 = vadd.f32 %v2359_v56, %v255_v52  ;;  %v2274_v59 = vadd.f32 %v2273_v60, %v2245_v57  ;;  %v2302_v6 = vpop.f32.mrf.mxu3 }
 0x215   : > { %2377 = vst [vmem:[#allocation8 + $0x30] sm:$0xff] %v2369_v55  ;;  %v2303_v45 = vadd.f32 %v2302_v6, %v2274_v59 }
 0x217   : > { %v2332_v63 = vadd.f32 %v2331_v21, %v2303_v45 }
 0x219   : > { %v2361_v0 = vadd.f32 %v2360_v61, %v2332_v63  ;;  %2382 = sbr.rel (%p3385_p5) target bundleno = 555 (0x22b), region = 52 }
 0x21b   : > { %v2370_v49 = vadd.f32 %v2361_v0, %v256_v62 }
 0x21d   : > { %2378 = vst [vmem:[#allocation8 + $0x38] sm:$0xff] %v2370_v49 }
 0x21e   : > { %v2383_v3 = vld [vmem:[#allocation8] sm:$0xff]  ;;  %v3698_v30 = vld [vmem:[#allocation7] ss:$0 sm:$0xff]  ;;  %v2384_v29 = vld [vmem:[#allocation8 + $0x8] sm:$0xff] }
 0x21f   : > { %v2385_v50 = vld [vmem:[#allocation8 + $0x10] sm:$0xff]  ;;  %v2386_v1 = vld [vmem:[#allocation8 + $0x18] sm:$0xff]  ;;  %v2395_v58 = vadd.f32 %v3698_v30, %v2383_v3  ;;  %v2396_v32 = vadd.f32 %v3698_v30, %v2384_v29  ;;  %v2387_v2 = vld [vmem:[#allocation8 + $0x20] sm:$0xff] }
 0x220   : > { %v2397_v54 = vadd.f32 %v3698_v30, %v2385_v50  ;;  %v2398_v37 = vadd.f32 %v3698_v30, %v2386_v1  ;;  %v2388_v36 = vld [vmem:[#allocation8 + $0x28] sm:$0xff]  ;;  %v2389_v5 = vld [vmem:[#allocation8 + $0x30] sm:$0xff]  ;;  %v2399_v38 = vadd.f32 %v3698_v30, %v2387_v2 }
 0x221   : > { %v2400_v7 = vadd.f32 %v3698_v30, %v2388_v36  ;;  %v2403_v39 = vmax.f32 %v2395_v58, 0.0  ;;  %v2404_v53 = vmax.f32 %v2396_v32, 0.0  ;;  %v2401_v10 = vadd.f32 %v3698_v30, %v2389_v5 }
 0x222   : > { %v2405_v9 = vmax.f32 %v2397_v54, 0.0  ;;  %v2406_v34 = vmax.f32 %v2398_v37, 0.0  ;;  %v2407_v42 = vmax.f32 %v2399_v38, 0.0 }
 0x223   : > { %2411 = vst [vmem:[#allocation8] sm:$0xff] %v2403_v39  ;;  %v2408_v12 = vmax.f32 %v2400_v7, 0.0  ;;  %v2409_v13 = vmax.f32 %v2401_v10, 0.0 }
 0x224   : > { %v2390_v33 = vld [vmem:[#allocation8 + $0x38] sm:$0xff]  ;;  %2412 = vst [vmem:[#allocation8 + $0x8] sm:$0xff] %v2404_v53 }
 0x225   : > { %v2402_v4 = vadd.f32 %v3698_v30, %v2390_v33  ;;  %2413 = vst [vmem:[#allocation8 + $0x10] sm:$0xff] %v2405_v9 }
 0x226   : > { %2414 = vst [vmem:[#allocation8 + $0x18] sm:$0xff] %v2406_v34 }
 0x227   : > { %v2410_v8 = vmax.f32 %v2402_v4, 0.0  ;;  %2415 = vst [vmem:[#allocation8 + $0x20] sm:$0xff] %v2407_v42 }
 0x228   : > { %2416 = vst [vmem:[#allocation8 + $0x28] sm:$0xff] %v2408_v12 }
 0x229   : > { %2417 = vst [vmem:[#allocation8 + $0x30] sm:$0xff] %v2409_v13 }
 0x22a   : > { %2418 = vst [vmem:[#allocation8 + $0x38] sm:$0xff] %v2410_v8 }
 0x22b PF: > { %p3654_p8 = scmp.eq.s32.totalorder %s3914_s16, 7  ;;  %s3872_s22 = smov [#allocation8]  }
 0x22c   : > { %s2424_s23 = sshll.u32 %s3872_s22, 4  ;;  %s2426_s24 = sshll.u32 %s4448_s3, 4  ;;  %s2425_s23 = int_to_ptr.vmem [resolvable:$true] %s2424_s23  ;;  %s2427_s24 = int_to_ptr.hbm [resolvable:$true] %s2426_s24 }
 0x22d   : > { %s3873_s25 = smov 128   ;;  %s3874_s26 = smov 8  }
 0x22e   : > { %3637 = dma.vmem_to_hbm [thread:$0]  (%p3654_p8), %s2425_s23, 1024, %s2427_s24, [#allocation4], %s3873_s25, %s3873_s25, %s3874_s26  }
 0x22f   : > { %3846 = dma.done.wait (%p3654_p8), [#allocation4], 1024  }
 0x230   : > { %3848 = vsyncadd (%p3654_p8), [#allocation4], 4294966272 }
 0x231 PF: > { %p17_p9 = scmp.ge.s32.totalorder %s3917_s17, 10   ;;  %s4455_s12 = smov %s3855_s13 }
 0x232   : > { %s4456_s13 = smov %s3859_s14  ;;  %s4457_s14 = smov %s3927_s20 }
 0x233   : > { %s4458_s15 = smov %s3917_s17  ;;  %19 = sbr.rel (!%p17_p9) target bundleno = 8 (0x8), region = 94 }
 0x238   :  { %2443 = vsyncpa [#allocation3], 1 }
 0x239   :  { %2445 = vsyncpa [#allocation3 + $0x1], 1 }
 0x23a   :  { %2446 = vsyncpa [#allocation6], 1 }
 0x23b   :  { %2448 = vsyncpa [#allocation6 + $0x1], 1 }
 0x23c   :  { %2449 = vsyncpa [#allocation4], 1 }
 0x23d   :  { %2451 = vsyncpa [#allocation4 + $0x1], 1 }

</bundles_post_ra>
